<compile_context>
chip_gen: v7x
topology: tpu7x:2x2x1
jax: 0.10.0
libtpu: 0.0.40
codegen_flags: <defaults>
</compile_context>

<pallas_src>
import functools

import jax
import jax.numpy as jnp
from jax.experimental import pallas as pl
from jax.experimental.pallas import tpu as pltpu

D_IN = 300          # fasttext embedding dim (module spec)
H1 = 1024
H2 = 512
H3 = 256
LANE = 128


def _round_up(x, m):
    return ((x + m - 1) // m) * m


def _mlp_kernel(x_ref,
                w1_ref, b1_ref,
                w2_ref, b2_ref,
                w3_ref, b3_ref,
                w4_ref, b4_ref,
                out_ref):
    """Fused 4-layer MLP on one batch tile.

    x_ref:  [TB, 300] float32  (raw features, cast to bf16 in-kernel)
    w*_ref: bf16 weights, [in, out] layout so we do plain x @ W on the MXU.
    b*_ref: [1, out]   float32 biases (broadcast over the tile).
    out_ref:[TB, 128*ceil(num_class/128)] float32 lane-dense padded logits.

    All intermediates live in vregs/VMEM — no HBM round trips between layers.
    Dropout layers are the eval-mode identity.
    """
    # In-kernel bf16 cast of the input tile (avoids any wrapper-side copy).
    x = x_ref[...].astype(jnp.bfloat16)                       # [TB, 300]

    # Layer 1: 300 -> 1024, bias + ReLU fused with the bf16 re-pack.
    h = jnp.dot(x, w1_ref[...], preferred_element_type=jnp.float32)
    h = jnp.maximum(h + b1_ref[...], 0.0).astype(jnp.bfloat16)

    # Layer 2: 1024 -> 512, bias + ReLU + bf16.
    h = jnp.dot(h, w2_ref[...], preferred_element_type=jnp.float32)
    h = jnp.maximum(h + b2_ref[...], 0.0).astype(jnp.bfloat16)

    # Layer 3: 512 -> 256, bias + ReLU + bf16.
    h = jnp.dot(h, w3_ref[...], preferred_element_type=jnp.float32)
    h = jnp.maximum(h + b3_ref[...], 0.0).astype(jnp.bfloat16)

    # Layer 4: 256 -> num_class (padded to 128 lanes), logits.
    logits = jnp.dot(h, w4_ref[...], preferred_element_type=jnp.float32)
    out_ref[...] = logits + b4_ref[...]


@functools.partial(jax.jit, static_argnames=("num_class", "tile_batch_cap"))
def text_nn_forward(x, params, *, num_class, tile_batch_cap=512):
    """x: [B, 300] float32. Returns logits [B, num_class] float32."""
    (w1, b1), (w2, b2), (w3, b3), (w4, b4) = params
    batch, d_in = x.shape
    nc_pad = w4.shape[1]                      # lane-dense padded class dim

    # Guard the lane-dense-output assumption (see correctness notes).
    assert d_in == D_IN and w1.shape[0] == D_IN, "expected 300-dim fasttext input"
    assert nc_pad % LANE == 0 and nc_pad >= num_class, (
        "w4 output dim must be num_class zero-padded to a multiple of 128")

    # Batch tiling: multiple of 8 (sublane), cap 512, chosen so batch_pad
    # overshoots by at most a few sublane rows (never a full tile of zeros).
    batch8 = _round_up(batch, 8)
    if batch8 <= tile_batch_cap:
        tile_batch = batch8                        # single grid step
    else:
        num_tiles = pl.cdiv(batch8, tile_batch_cap)
        tile_batch = _round_up(pl.cdiv(batch8, num_tiles), 8)
    batch_pad = _round_up(batch8, tile_batch)

    # Only a tiny batch-dim pad (<= a few sublane rows) — no feature pad, no
    # dtype-cast copy: the kernel reads the original f32 rows directly.
    x_in = x if batch_pad == batch else jnp.pad(x, ((0, batch_pad - batch), (0, 0)))

    grid = (batch_pad // tile_batch,)

    # Batch tile moves with the grid; weights/biases are grid-invariant
    # (constant index_map) so they are DMA'd once and stay resident in VMEM.
    x_spec = pl.BlockSpec((tile_batch, D_IN), lambda i: (i, 0))
    out_spec = pl.BlockSpec((tile_batch, nc_pad), lambda i: (i, 0))

    def resident(shape):
        return pl.BlockSpec(shape, lambda i: (0, 0))

    logits_pad = pl.pallas_call(
        _mlp_kernel,
        out_shape=jax.ShapeDtypeStruct((batch_pad, nc_pad), jnp.float32),
        grid_spec=pltpu.PrefetchScalarGridSpec(
            num_scalar_prefetch=0,
            grid=grid,
            in_specs=[
                x_spec,
                resident(w1.shape), resident(b1.shape),
                resident(w2.shape), resident(b2.shape),
                resident(w3.shape), resident(b3.shape),
                resident(w4.shape), resident(b4.shape),
            ],
            out_specs=out_spec,
        ),
        compiler_params=pltpu.CompilerParams(
            dimension_semantics=("parallel",),
        ),
    )(x_in, w1, b1, w2, b2, w3, b3, w4, b4)

    return logits_pad[:batch, :num_class]


def init_params(key, num_class):
    """Deterministic parameter init mirroring nn.Linear shapes.

    Weights are stored [in, out] (transposed vs. torch) in bfloat16; only the
    layer-4 output dim is zero-padded num_class -> multiple of 128 so the
    final store is lane-dense.  Biases stay float32, shaped [1, out].
    """
    nc_pad = _round_up(max(num_class, LANE), LANE)
    dims = [(D_IN, H1, H1),
            (H1, H2, H2),
            (H2, H3, H3),
            (H3, num_class, nc_pad)]
    params = []
    for (fan_in, fan_out, fan_out_pad) in dims:
        key, kw, kb = jax.random.split(key, 3)
        bound = 1.0 / jnp.sqrt(fan_in)  # torch.nn.Linear default init bound
        w = jax.random.uniform(kw, (fan_in, fan_out), jnp.float32, -bound, bound)
        b = jax.random.uniform(kb, (1, fan_out), jnp.float32, -bound, bound)
        # Zero-pad only the output dim where needed (padding contributes 0).
        w = jnp.pad(w, ((0, 0), (0, fan_out_pad - fan_out)))
        b = jnp.pad(b, ((0, 0), (0, fan_out_pad - fan_out)))
        params.append((w.astype(jnp.bfloat16), b))
    return params


def reference_forward(x, params, num_class):
    """Pure-JAX reference using the same bf16 weights / f32 accumulation."""
    (w1, b1), (w2, b2), (w3, b3), (w4, b4) = params

    def dense(h, w, b, relu):
        y = jnp.dot(h.astype(jnp.bfloat16), w,
                    preferred_element_type=jnp.float32) + b
        return jnp.maximum(y, 0.0) if relu else y

    h = dense(x, w1, b1, True)
    h = dense(h, w2, b2, True)
    h = dense(h, w3, b3, True)
    logits = dense(h, w4, b4, False)
    return logits[:, :num_class]


if __name__ == "__main__":
    key = jax.random.PRNGKey(0)
    k_in, k_params = jax.random.split(key)

    batch = 8
    num_class = 10

    # Synthetic "averaged fasttext sentence embedding" input: [B, 300]
    x = jax.random.normal(k_in, (batch, D_IN), dtype=jnp.float32)
    params = init_params(k_params, num_class)

    logits = text_nn_forward(x, params, num_class=num_class)
    logits = jax.block_until_ready(logits)

    ref = reference_forward(x, params, num_class)
    assert logits.shape == (batch, num_class)
    assert jnp.allclose(logits, ref, atol=1e-2, rtol=1e-2), "mismatch vs reference"

    print("KERNEL_OK")
</pallas_src>

<mosaic_0001>
module attributes {stable_mosaic.version = 11 : i64} {
  func.func @_mlp_kernel(%arg0: i32, %arg1: memref<8x300xf32, #tpu.memory_space<vmem>>, %arg2: memref<300x1024xbf16, #tpu.memory_space<vmem>>, %arg3: memref<1x1024xf32, #tpu.memory_space<vmem>>, %arg4: memref<1024x512xbf16, #tpu.memory_space<vmem>>, %arg5: memref<1x512xf32, #tpu.memory_space<vmem>>, %arg6: memref<512x256xbf16, #tpu.memory_space<vmem>>, %arg7: memref<1x256xf32, #tpu.memory_space<vmem>>, %arg8: memref<256x128xbf16, #tpu.memory_space<vmem>>, %arg9: memref<1x128xf32, #tpu.memory_space<vmem>>, %arg10: memref<8x128xf32, #tpu.memory_space<vmem>>) attributes {dimension_semantics = [#tpu.dimension_semantics<parallel>], iteration_bounds = array<i64: 1>, scalar_prefetch = 0 : i64, scratch_operands = 0 : i64, tpu.core_type = #tpu.core_type<tc>, window_params = [{transform_indices = @transform_0, window_bounds = array<i64: 8, 300>}, {pipeline_mode = #tpu.pipeline_mode<synchronous>, transform_indices = @transform_1, window_bounds = array<i64: 300, 1024>}, {pipeline_mode = #tpu.pipeline_mode<synchronous>, transform_indices = @transform_2, window_bounds = array<i64: 1, 1024>}, {pipeline_mode = #tpu.pipeline_mode<synchronous>, transform_indices = @transform_3, window_bounds = array<i64: 1024, 512>}, {pipeline_mode = #tpu.pipeline_mode<synchronous>, transform_indices = @transform_4, window_bounds = array<i64: 1, 512>}, {pipeline_mode = #tpu.pipeline_mode<synchronous>, transform_indices = @transform_5, window_bounds = array<i64: 512, 256>}, {pipeline_mode = #tpu.pipeline_mode<synchronous>, transform_indices = @transform_6, window_bounds = array<i64: 1, 256>}, {pipeline_mode = #tpu.pipeline_mode<synchronous>, transform_indices = @transform_7, window_bounds = array<i64: 256, 128>}, {pipeline_mode = #tpu.pipeline_mode<synchronous>, transform_indices = @transform_8, window_bounds = array<i64: 1, 128>}, {transform_indices = @transform_9, window_bounds = array<i64: 8, 128>}]} {
    %c0 = arith.constant 0 : index
    %c0_0 = arith.constant 0 : index
    %0 = vector.load %arg1[%c0, %c0_0] : memref<8x300xf32, #tpu.memory_space<vmem>>, vector<8x300xf32>
    %1 = arith.truncf %0 : vector<8x300xf32> to vector<8x300xbf16>
    %c0_1 = arith.constant 0 : index
    %c0_2 = arith.constant 0 : index
    %2 = vector.load %arg2[%c0_1, %c0_2] : memref<300x1024xbf16, #tpu.memory_space<vmem>>, vector<300x1024xbf16>
    %cst = arith.constant dense<0.000000e+00> : vector<8x1024xf32>
    %3 = tpu.matmul %1, %2, %cst {dimension_numbers = #tpu.dot_dimension_numbers<[1], [0], [0], [1], [0, 0, 1, 1], [], []>} : vector<8x300xbf16>, vector<300x1024xbf16>, vector<8x1024xf32> -> vector<8x1024xf32>
    %c0_3 = arith.constant 0 : index
    %c0_4 = arith.constant 0 : index
    %4 = vector.load %arg3[%c0_3, %c0_4] : memref<1x1024xf32, #tpu.memory_space<vmem>>, vector<1x1024xf32>
    %5 = vector.broadcast %4 : vector<1x1024xf32> to vector<8x1024xf32>
    %6 = arith.addf %3, %5 : vector<8x1024xf32>
    %cst_5 = arith.constant 0.000000e+00 : f32
    %7 = vector.broadcast %cst_5 : f32 to vector<8x1024xf32>
    %8 = arith.maximumf %6, %7 : vector<8x1024xf32>
    %9 = arith.truncf %8 : vector<8x1024xf32> to vector<8x1024xbf16>
    %c0_6 = arith.constant 0 : index
    %c0_7 = arith.constant 0 : index
    %10 = vector.load %arg4[%c0_6, %c0_7] : memref<1024x512xbf16, #tpu.memory_space<vmem>>, vector<1024x512xbf16>
    %cst_8 = arith.constant dense<0.000000e+00> : vector<8x512xf32>
    %11 = tpu.matmul %9, %10, %cst_8 {dimension_numbers = #tpu.dot_dimension_numbers<[1], [0], [0], [1], [0, 0, 1, 1], [], []>} : vector<8x1024xbf16>, vector<1024x512xbf16>, vector<8x512xf32> -> vector<8x512xf32>
    %c0_9 = arith.constant 0 : index
    %c0_10 = arith.constant 0 : index
    %12 = vector.load %arg5[%c0_9, %c0_10] : memref<1x512xf32, #tpu.memory_space<vmem>>, vector<1x512xf32>
    %13 = vector.broadcast %12 : vector<1x512xf32> to vector<8x512xf32>
    %14 = arith.addf %11, %13 : vector<8x512xf32>
    %cst_11 = arith.constant 0.000000e+00 : f32
    %15 = vector.broadcast %cst_11 : f32 to vector<8x512xf32>
    %16 = arith.maximumf %14, %15 : vector<8x512xf32>
    %17 = arith.truncf %16 : vector<8x512xf32> to vector<8x512xbf16>
    %c0_12 = arith.constant 0 : index
    %c0_13 = arith.constant 0 : index
    %18 = vector.load %arg6[%c0_12, %c0_13] : memref<512x256xbf16, #tpu.memory_space<vmem>>, vector<512x256xbf16>
    %cst_14 = arith.constant dense<0.000000e+00> : vector<8x256xf32>
    %19 = tpu.matmul %17, %18, %cst_14 {dimension_numbers = #tpu.dot_dimension_numbers<[1], [0], [0], [1], [0, 0, 1, 1], [], []>} : vector<8x512xbf16>, vector<512x256xbf16>, vector<8x256xf32> -> vector<8x256xf32>
    %c0_15 = arith.constant 0 : index
    %c0_16 = arith.constant 0 : index
    %20 = vector.load %arg7[%c0_15, %c0_16] : memref<1x256xf32, #tpu.memory_space<vmem>>, vector<1x256xf32>
    %21 = vector.broadcast %20 : vector<1x256xf32> to vector<8x256xf32>
    %22 = arith.addf %19, %21 : vector<8x256xf32>
    %cst_17 = arith.constant 0.000000e+00 : f32
    %23 = vector.broadcast %cst_17 : f32 to vector<8x256xf32>
    %24 = arith.maximumf %22, %23 : vector<8x256xf32>
    %25 = arith.truncf %24 : vector<8x256xf32> to vector<8x256xbf16>
    %c0_18 = arith.constant 0 : index
    %c0_19 = arith.constant 0 : index
    %26 = vector.load %arg8[%c0_18, %c0_19] : memref<256x128xbf16, #tpu.memory_space<vmem>>, vector<256x128xbf16>
    %cst_20 = arith.constant dense<0.000000e+00> : vector<8x128xf32>
    %27 = tpu.matmul %25, %26, %cst_20 {dimension_numbers = #tpu.dot_dimension_numbers<[1], [0], [0], [1], [0, 0, 1, 1], [], []>} : vector<8x256xbf16>, vector<256x128xbf16>, vector<8x128xf32> -> vector<8x128xf32>
    %c0_21 = arith.constant 0 : index
    %c0_22 = arith.constant 0 : index
    %28 = vector.load %arg9[%c0_21, %c0_22] : memref<1x128xf32, #tpu.memory_space<vmem>>, vector<1x128xf32>
    %29 = vector.broadcast %28 : vector<1x128xf32> to vector<8x128xf32>
    %30 = arith.addf %27, %29 : vector<8x128xf32>
    %c0_23 = arith.constant 0 : index
    %c0_24 = arith.constant 0 : index
    %31 = vector.load %arg10[%c0_23, %c0_24] : memref<8x128xf32, #tpu.memory_space<vmem>>, vector<8x128xf32>
    tpu.vector_store %arg10[%c0_23, %c0_24], %30 {strides = array<i32>} : memref<8x128xf32, #tpu.memory_space<vmem>>, vector<8x128xf32>,
    return
  }
  func.func @transform_0(%arg0: i32) -> (i32, i32) {
    %c0_i32 = arith.constant 0 : i32
    %c0_i32_0 = arith.constant 0 : i32
    return %arg0, %c0_i32 : i32, i32
  }
  func.func @transform_1(%arg0: i32) -> (i32, i32) {
    %c0_i32 = arith.constant 0 : i32
    %c0_i32_0 = arith.constant 0 : i32
    %c0_i32_1 = arith.constant 0 : i32
    return %c0_i32, %c0_i32_0 : i32, i32
  }
  func.func @transform_2(%arg0: i32) -> (i32, i32) {
    %c0_i32 = arith.constant 0 : i32
    %c0_i32_0 = arith.constant 0 : i32
    %c0_i32_1 = arith.constant 0 : i32
    return %c0_i32, %c0_i32_0 : i32, i32
  }
  func.func @transform_3(%arg0: i32) -> (i32, i32) {
    %c0_i32 = arith.constant 0 : i32
    %c0_i32_0 = arith.constant 0 : i32
    %c0_i32_1 = arith.constant 0 : i32
    return %c0_i32, %c0_i32_0 : i32, i32
  }
  func.func @transform_4(%arg0: i32) -> (i32, i32) {
    %c0_i32 = arith.constant 0 : i32
    %c0_i32_0 = arith.constant 0 : i32
    %c0_i32_1 = arith.constant 0 : i32
    return %c0_i32, %c0_i32_0 : i32, i32
  }
  func.func @transform_5(%arg0: i32) -> (i32, i32) {
    %c0_i32 = arith.constant 0 : i32
    %c0_i32_0 = arith.constant 0 : i32
    %c0_i32_1 = arith.constant 0 : i32
    return %c0_i32, %c0_i32_0 : i32, i32
  }
  func.func @transform_6(%arg0: i32) -> (i32, i32) {
    %c0_i32 = arith.constant 0 : i32
    %c0_i32_0 = arith.constant 0 : i32
    %c0_i32_1 = arith.constant 0 : i32
    return %c0_i32, %c0_i32_0 : i32, i32
  }
  func.func @transform_7(%arg0: i32) -> (i32, i32) {
    %c0_i32 = arith.constant 0 : i32
    %c0_i32_0 = arith.constant 0 : i32
    %c0_i32_1 = arith.constant 0 : i32
    return %c0_i32, %c0_i32_0 : i32, i32
  }
  func.func @transform_8(%arg0: i32) -> (i32, i32) {
    %c0_i32 = arith.constant 0 : i32
    %c0_i32_0 = arith.constant 0 : i32
    %c0_i32_1 = arith.constant 0 : i32
    return %c0_i32, %c0_i32_0 : i32, i32
  }
  func.func @transform_9(%arg0: i32) -> (i32, i32) {
    %c0_i32 = arith.constant 0 : i32
    %c0_i32_0 = arith.constant 0 : i32
    return %arg0, %c0_i32 : i32, i32
  }
}

</mosaic_0001>

<bundles_post_ra>
// kernel: text_nn_forward.1
= control target key start
LH: loop header
LB: loop body
LE: loop exit
PB: predicated region body
PF: predicated region fallthrough
CT: control target
= control target key end

     0   :  { %14 = vsyncpa [#allocation3], 0  ;;  %s5508_s0 = inlined_call_operand.hbm [shape: f32[8,300], index: 0, kind: input, shape index: {}]   ;;  %s5509_s1 = inlined_call_operand.hbm [shape: bf16[300,1024], index: 1, kind: input, shape index: {}]   ;;  %s5510_s2 = inlined_call_operand.hbm [shape: f32[1,1024], index: 2, kind: input, shape index: {}]   ;;  %s5511_s3 = inlined_call_operand.hbm [shape: bf16[1024,512], index: 3, kind: input, shape index: {}]   ;;  %s5512_s4 = inlined_call_operand.vmem [shape: f32[1,512], index: 4, kind: input, shape index: {}]   ;;  %s5513_s5 = inlined_call_operand.hbm [shape: bf16[512,256], index: 5, kind: input, shape index: {}]   ;;  %s5514_s6 = inlined_call_operand.vmem [shape: f32[1,256], index: 6, kind: input, shape index: {}]   ;;  %s5515_s7 = inlined_call_operand.hbm [shape: bf16[256,128], index: 7, kind: input, shape index: {}]   ;;  %s5516_s8 = inlined_call_operand.vmem [shape: f32[1,128], index: 8, kind: input, shape index: {}]   ;;  %s5517_s9 = inlined_call_operand.hbm [shape: f32[8,128], index: 9, kind: output, shape index: {}]  }
   0x1   :  { %15 = vsyncpa [#allocation6], 0 }
   0x2   :  { %16 = vsyncpa [#allocation9], 0 }
   0x3   :  { %17 = vsyncpa [#allocation12], 0 }
   0x4   :  { %18 = vsyncpa [#allocation4], 0  ;;  %s5256_s30 = smov [#allocation5]   ;;  %s5092_s13 = scalar_lea.hbm %s5509_s1, 19456 }
   0x5   :  { %s34_s10 = sshll.u32 %s5256_s30, 4  ;;  %p5093_p0 = scmp.ne.s32.totalorder %s5509_s1, %s5092_s13  ;;  %s35_s10 = int_to_ptr.vmem [resolvable:$true] %s34_s10 }
   0x6   :  { %p5096_p1 = scmp.lt.u32.totalorder %s5092_s13, %s5509_s1 }
   0x8   :  { %p5098_p2 = pnand %p5096_p1, %p5093_p0 }
   0xa   :  { %5101 = shalt.err (!%p5098_p2)
}
   0xb   :  { %s5102_s18 = scalar_lea.vmem %s35_s10, 19456  ;;  %p5107_p4 = scmp.lt.s32.totalorder %s35_s10, %s35_s10 }
   0xc   :  { %p5103_p3 = scmp.ne.s32.totalorder %s35_s10, %s5102_s18  ;;  %p5108_p5 = scmp.lt.s32.totalorder %s5102_s18, %s5102_s18 }
   0xe   :  { %p5109_p6 = por %p5108_p5, %p5107_p4 }
  0x10   :  { %p5110_p7 = pnand %p5109_p6, %p5103_p3 }
  0x12   :  { %5113 = shalt.err (!%p5110_p7)
}
  0x13   :  { %s5257_s19 = smov 512   ;;  %s5258_s20 = smov 32  }
  0x14   :  { %40 = dma.hbm_to_vmem [thread:$0]  %s5509_s1, 19456, %s35_s10, [#allocation6], %s5257_s19, %s5257_s19, %s5258_s20  }
  0x15   :  { %s5259_s23 = smov [#allocation8]   ;;  %s5114_s27 = scalar_lea.hbm %s5511_s3, 32768 }
  0x16   :  { %s56_s24 = sshll.u32 %s5259_s23, 4  ;;  %p5115_p8 = scmp.ne.s32.totalorder %s5511_s3, %s5114_s27  ;;  %s57_s24 = int_to_ptr.vmem [resolvable:$true] %s56_s24 }
  0x17   :  { %p5118_p9 = scmp.lt.u32.totalorder %s5114_s27, %s5511_s3 }
  0x19   :  { %p5120_p10 = pnand %p5118_p9, %p5115_p8 }
  0x1b   :  { %5123 = shalt.err (!%p5120_p10)
}
  0x1c   :  { %s5124_s12 = scalar_lea.vmem %s57_s24, 32768  ;;  %p5129_p12 = scmp.lt.s32.totalorder %s57_s24, %s57_s24 }
  0x1d   :  { %p5125_p11 = scmp.ne.s32.totalorder %s57_s24, %s5124_s12  ;;  %p5130_p13 = scmp.lt.s32.totalorder %s5124_s12, %s5124_s12 }
  0x1f   :  { %p5131_p0 = por %p5130_p13, %p5129_p12 }
  0x21   :  { %p5132_p1 = pnand %p5131_p0, %p5125_p11 }
  0x23   :  { %5135 = shalt.err (!%p5132_p1)
}
  0x24   :  { %s5260_s1 = smov 256   ;;  %s5261_s10 = smov 16  }
  0x25   :  { %62 = dma.hbm_to_vmem [thread:$0]  %s5511_s3, 32768, %s57_s24, [#allocation9], %s5260_s1, %s5260_s1, %s5261_s10  }
  0x26   :  { %s5262_s15 = smov [#allocation2]   ;;  %s5263_s17 = smov [#allocation7]  }
  0x27   :  { %s25_s16 = sshll.u32 %s5262_s15, 4  ;;  %s47_s18 = sshll.u32 %s5263_s17, 4  ;;  %s26_s16 = int_to_ptr.vmem [resolvable:$true] %s25_s16  ;;  %s48_s18 = int_to_ptr.vmem [resolvable:$true] %s47_s18 }
  0x28   :  { %s5136_s21 = scalar_lea.hbm %s5508_s0, 384 }
  0x29   :  { %p5137_p2 = scmp.ne.s32.totalorder %s5508_s0, %s5136_s21  ;;  %p5140_p3 = scmp.lt.u32.totalorder %s5136_s21, %s5508_s0 }
  0x2b   :  { %p5142_p4 = pnand %p5140_p3, %p5137_p2 }
  0x2d   :  { %5145 = shalt.err (!%p5142_p4)
}
  0x2e   :  { %s5146_s3 = scalar_lea.vmem %s26_s16, 384  ;;  %p5151_p6 = scmp.lt.s32.totalorder %s26_s16, %s26_s16 }
  0x2f   :  { %p5147_p5 = scmp.ne.s32.totalorder %s26_s16, %s5146_s3  ;;  %p5152_p7 = scmp.lt.s32.totalorder %s5146_s3, %s5146_s3 }
  0x31   :  { %p5153_p8 = por %p5152_p7, %p5151_p6 }
  0x33   :  { %p5154_p9 = pnand %p5153_p8, %p5147_p5 }
  0x35   :  { %5157 = shalt.err (!%p5154_p9)
}
  0x36   :  { %28 = dma.hbm_to_vmem [thread:$0]  %s5508_s0, 384, %s26_s16, [#allocation3]  }
  0x37   :  { %s5158_s30 = scalar_lea.hbm %s5510_s2, 128 }
  0x38   :  { %p5159_p10 = scmp.ne.s32.totalorder %s5510_s2, %s5158_s30  ;;  %p5162_p11 = scmp.lt.u32.totalorder %s5158_s30, %s5510_s2 }
  0x3a   :  { %p5164_p12 = pnand %p5162_p11, %p5159_p10 }
  0x3c   :  { %5167 = shalt.err (!%p5164_p12)
}
  0x3d   :  { %s5168_s13 = scalar_lea.vmem %s48_s18, 128  ;;  %p5173_p0 = scmp.lt.s32.totalorder %s48_s18, %s48_s18 }
  0x3e   :  { %p5169_p13 = scmp.ne.s32.totalorder %s48_s18, %s5168_s13  ;;  %p5174_p1 = scmp.lt.s32.totalorder %s5168_s13, %s5168_s13 }
  0x40   :  { %p5175_p2 = por %p5174_p1, %p5173_p0 }
  0x42   :  { %p5176_p3 = pnand %p5175_p2, %p5169_p13 }
  0x44   :  { %5179 = shalt.err (!%p5176_p3)
}
  0x45   :  { %50 = dma.hbm_to_vmem [thread:$0]  %s5510_s2, 128, %s48_s18, [#allocation6]  }
  0x46   :  { %s5264_s15 = smov [#allocation10]   ;;  %s5180_s20 = scalar_lea.hbm %s5513_s5, 8192 }
  0x47   :  { %s70_s16 = sshll.u32 %s5264_s15, 4  ;;  %p5181_p4 = scmp.ne.s32.totalorder %s5513_s5, %s5180_s20  ;;  %s71_s16 = int_to_ptr.vmem [resolvable:$true] %s70_s16 }
  0x48   :  { %p5184_p5 = scmp.lt.u32.totalorder %s5180_s20, %s5513_s5 }
  0x4a   :  { %p5186_p6 = pnand %p5184_p5, %p5181_p4 }
  0x4c   :  { %5189 = shalt.err (!%p5186_p6)
}
  0x4d   :  { %s5190_s26 = scalar_lea.vmem %s71_s16, 8192  ;;  %p5195_p8 = scmp.lt.s32.totalorder %s71_s16, %s71_s16 }
  0x4e   :  { %p5191_p7 = scmp.ne.s32.totalorder %s71_s16, %s5190_s26  ;;  %p5196_p9 = scmp.lt.s32.totalorder %s5190_s26, %s5190_s26 }
  0x50   :  { %p5197_p10 = por %p5196_p9, %p5195_p8 }
  0x52   :  { %p5198_p11 = pnand %p5197_p10, %p5191_p7 }
  0x54   :  { %5201 = shalt.err (!%p5198_p11)
}
  0x55   :  { %s5265_s2 = smov 128   ;;  %s5266_s18 = smov 8  }
  0x56   :  { %76 = dma.hbm_to_vmem [thread:$0]  %s5513_s5, 8192, %s71_s16, [#allocation9], %s5265_s2, %s5265_s2, %s5266_s18  }
  0x57   :  { %s5267_s27 = smov [#allocation11]   ;;  %s5202_s11 = scalar_lea.hbm %s5515_s7, 2048 }
  0x58   :  { %s84_s28 = sshll.u32 %s5267_s27, 4  ;;  %p5203_p12 = scmp.ne.s32.totalorder %s5515_s7, %s5202_s11  ;;  %s85_s28 = int_to_ptr.vmem [resolvable:$true] %s84_s28 }
  0x59   :  { %p5206_p13 = scmp.lt.u32.totalorder %s5202_s11, %s5515_s7 }
  0x5b   :  { %p5208_p0 = pnand %p5206_p13, %p5203_p12 }
  0x5d   :  { %5211 = shalt.err (!%p5208_p0)
}
  0x5e   :  { %s5212_s0 = scalar_lea.vmem %s85_s28, 2048  ;;  %p5217_p2 = scmp.lt.s32.totalorder %s85_s28, %s85_s28 }
  0x5f   :  { %p5213_p1 = scmp.ne.s32.totalorder %s85_s28, %s5212_s0  ;;  %p5218_p3 = scmp.lt.s32.totalorder %s5212_s0, %s5212_s0 }
  0x61   :  { %p5219_p4 = por %p5218_p3, %p5217_p2 }
  0x63   :  { %p5220_p5 = pnand %p5219_p4, %p5213_p1 }
  0x65   :  { %5223 = shalt.err (!%p5220_p5)
}
  0x66   :  { %s5268_s5 = smov 64   ;;  %s5269_s14 = smov 4  }
  0x67   :  { %90 = dma.hbm_to_vmem [thread:$0]  %s5515_s7, 2048, %s85_s28, [#allocation12], %s5268_s5, %s5268_s5, %s5269_s14  }
  0x68   :  { %5246 = dma.done.wait [#allocation3], 384  }
  0x69   :  { %5247 = vsyncadd [#allocation3], 4294966912 }
  0x6a   :  { %5248 = dma.done.wait [#allocation6], 19584  }
  0x6b   :  { %5249 = vsyncadd [#allocation6], 4294947712 }
  0x6c   :  { %5250 = dma.done.wait [#allocation9], 40960  }
  0x6d   :  { %5251 = vsyncadd [#allocation9], 4294926336 }
  0x6e   :  { %5252 = dma.done.wait [#allocation12], 2048  }
  0x6f   :  { %5253 = vsyncadd [#allocation12], 4294965248  ;;  %v5270_v0 = vmov 0   ;;  %v118_v1 = vld [vmem:[#allocation5] sm:$0xff]  ;;  %v113_v28 = vld [vmem:[#allocation2 + $0x8] sm:$0xff]  ;;  %vm1068_vm0 = vcmask 1045504  }
  0x70   :  { %1166 = vmatprep.mubr.bf16.mxu0 %v5270_v0  ;;  %v122_v2 = vld [vmem:[#allocation5 + $0x20] sm:$0xff]  ;;  %v5395_v35 = vpack.c.bf16 %v113_v28, %v113_v28  ;;  %v114_v39 = vld [vmem:[#allocation2 + $0x10] sm:$0xff]  ;;  %v247_v42 = vld [vmem:[#allocation5 + $0x408] sm:$0xff]  ;;  %vm1064_vm1 = vcmask 359424  }
  0x71   :  { %v126_v3 = vld [vmem:[#allocation5 + $0x40] sm:$0xff]  ;;  %v4008_v4 = vcombine.high %v118_v1, %v122_v2  ;;  %v4007_v5 = vcombine.low %v118_v1, %v122_v2  ;;  %v251_v43 = vld [vmem:[#allocation5 + $0x428] sm:$0xff]  ;;  %v5400_v47 = vpack.c.bf16 %v114_v39, %v114_v39  ;;  %v120_v63 = vld [vmem:[#allocation5 + $0x10] sm:$0xff] }
  0x72   :  { %v130_v6 = vld [vmem:[#allocation5 + $0x60] sm:$0xff]  ;;  %1125 = vmatprep.mubr.bf16.mxu1 %v5395_v35  ;;  %v4138_v44 = vcombine.high %v247_v42, %v251_v43  ;;  %v255_v45 = vld [vmem:[#allocation5 + $0x448] sm:$0xff]  ;;  %v4137_v50 = vcombine.low %v247_v42, %v251_v43  ;;  %v124_v1 = vld [vmem:[#allocation5 + $0x30] sm:$0xff] }
  0x73   :  { %v4016_v7 = vcombine.high %v126_v3, %v130_v6  ;;  %v134_v8 = vld [vmem:[#allocation5 + $0x80] sm:$0xff]  ;;  %1093 = vmatprep.subr.bf16.mxu1 %v4008_v4  ;;  %v4015_v10 = vcombine.low %v126_v3, %v130_v6  ;;  %v259_v48 = vld [vmem:[#allocation5 + $0x468] sm:$0xff]  ;;  %v164_v42 = vld [vmem:[#allocation5 + $0x170] sm:$0xff] }
  0x74   :  { %v138_v9 = vld [vmem:[#allocation5 + $0xa0] sm:$0xff]  ;;  %1094 = vmatpush1.bf16.msra.mxu1 %v4007_v5  ;;  %v4146_v53 = vcombine.high %v255_v45, %v259_v48  ;;  %v263_v54 = vld [vmem:[#allocation5 + $0x488] sm:$0xff]  ;;  %v4145_v58 = vcombine.low %v255_v45, %v259_v48 }
  0x75   :  { %1095 = vmatprep.subr.bf16.mxu1 %v4016_v7  ;;  %v4024_v11 = vcombine.high %v134_v8, %v138_v9  ;;  %v142_v12 = vld [vmem:[#allocation5 + $0xc0] sm:$0xff]  ;;  %v4023_v14 = vcombine.low %v134_v8, %v138_v9  ;;  %v267_v55 = vld [vmem:[#allocation5 + $0x4a8] sm:$0x33]  ;;  %v4012_v7 = vcombine.high %v120_v63, %v124_v1  ;;  %v128_v8 = vld [vmem:[#allocation5 + $0x50] sm:$0xff] }
  0x76   :  { %v146_v13 = vld [vmem:[#allocation5 + $0xe0] sm:$0xff]  ;;  %v4154_v61 = vcombine.high %v263_v54, %v267_v55  ;;  %v4153_v62 = vcombine.low %v263_v54, %v267_v55  ;;  %v132_v9 = vld [vmem:[#allocation5 + $0x70] sm:$0xff] }
  0x77   :  { %v246_v15 = vld [vmem:[#allocation5 + $0x400] sm:$0xff]  ;;  %v4032_v16 = vcombine.high %v142_v12, %v146_v13  ;;  %v4031_v27 = vcombine.low %v142_v12, %v146_v13  ;;  %v4011_v12 = vcombine.low %v120_v63, %v124_v1 }
  0x78   :  { %1096 = vmatpush1.bf16.msra.mxu1 %v4015_v10  ;;  %v150_v17 = vld [vmem:[#allocation5 + $0x100] sm:$0xff]  ;;  %v1076_v6 = vsel %vm1068_vm0, %v4153_v62, 0  ;;  %v123_v62 = vld [vmem:[#allocation5 + $0x28] sm:$0xff] }
  0x79   :  { %1097 = vmatprep.subr.bf16.mxu1 %v4024_v11  ;;  %v250_v18 = vld [vmem:[#allocation5 + $0x420] sm:$0xff] }
  0x7a   :  { %v154_v19 = vld [vmem:[#allocation5 + $0x120] sm:$0xff]  ;;  %v4136_v20 = vcombine.high %v246_v15, %v250_v18  ;;  %v4135_v21 = vcombine.low %v246_v15, %v250_v18  ;;  %v4020_v15 = vcombine.high %v128_v8, %v132_v9 }
  0x7b   :  { %v254_v22 = vld [vmem:[#allocation5 + $0x440] sm:$0xff]  ;;  %v4040_v29 = vcombine.high %v150_v17, %v154_v19  ;;  %v4039_v36 = vcombine.low %v150_v17, %v154_v19  ;;  %v140_v17 = vld [vmem:[#allocation5 + $0xb0] sm:$0xff] }
  0x7c   :  { %v258_v23 = vld [vmem:[#allocation5 + $0x460] sm:$0xff]  ;;  %1098 = vmatpush1.bf16.msra.mxu1 %v4023_v14  ;;  %1134 = vmatprep.subr.bf16.mxu0 %v4136_v20  ;;  %v4019_v20 = vcombine.low %v128_v8, %v132_v9  ;;  %v131_v8 = vld [vmem:[#allocation5 + $0x68] sm:$0xff] }
  0x7d   :  { %v4144_v24 = vcombine.high %v254_v22, %v258_v23  ;;  %v262_v25 = vld [vmem:[#allocation5 + $0x480] sm:$0xff]  ;;  %1099 = vmatprep.subr.bf16.mxu1 %v4032_v16  ;;  %1135 = vmatpush1.bf16.msra.mxu0 %v4135_v21  ;;  %v4143_v30 = vcombine.low %v254_v22, %v258_v23  ;;  %v136_v16 = vld [vmem:[#allocation5 + $0x90] sm:$0xff] }
  0x7e   :  { %v266_v26 = vld [vmem:[#allocation5 + $0x4a0] sm:$0x33]  ;;  %v4028_v23 = vcombine.high %v136_v16, %v140_v17  ;;  %v4027_v28 = vcombine.low %v136_v16, %v140_v17  ;;  %v135_v16 = vld [vmem:[#allocation5 + $0x88] sm:$0xff] }
  0x7f   :  { %v158_v31 = vld [vmem:[#allocation5 + $0x140] sm:$0xff]  ;;  %1136 = vmatprep.subr.bf16.mxu0 %v4144_v24  ;;  %v4152_v33 = vcombine.high %v262_v25, %v266_v26  ;;  %v4151_v34 = vcombine.low %v262_v25, %v266_v26  ;;  %v144_v24 = vld [vmem:[#allocation5 + $0xd0] sm:$0xff]  ;;  %v139_v17 = vld [vmem:[#allocation5 + $0xa8] sm:$0xff] }
  0x80   :  { %v162_v32 = vld [vmem:[#allocation5 + $0x160] sm:$0xff]  ;;  %1100 = vmatpush1.bf16.msra.mxu1 %v4031_v27  ;;  %v148_v25 = vld [vmem:[#allocation5 + $0xf0] sm:$0xff] }
  0x81   :  { %1101 = vmatprep.subr.bf16.mxu1 %v4040_v29  ;;  %v4048_v37 = vcombine.high %v158_v31, %v162_v32  ;;  %v166_v38 = vld [vmem:[#allocation5 + $0x180] sm:$0xff]  ;;  %1137 = vmatpush1.bf16.msra.mxu0 %v4143_v30  ;;  %v1070_v41 = vsel %vm1068_vm0, %v4151_v34, 0  ;;  %v4047_v46 = vcombine.low %v158_v31, %v162_v32  ;;  %v4036_v31 = vcombine.high %v144_v24, %v148_v25  ;;  %v152_v32 = vld [vmem:[#allocation5 + $0x110] sm:$0xff] }
  0x82   :  { %v170_v40 = vld [vmem:[#allocation5 + $0x1a0] sm:$0xff]  ;;  %4159 = vmatprep.subr.msk.bf16.mxu0 %vm1068_vm0, %v4152_v33  ;;  %v156_v33 = vld [vmem:[#allocation5 + $0x130] sm:$0xff] }
  0x83   :  { %v4056_v49 = vcombine.high %v166_v38, %v170_v40  ;;  %v174_v51 = vld [vmem:[#allocation5 + $0x1c0] sm:$0xff]  ;;  %v4055_v56 = vcombine.low %v166_v38, %v170_v40  ;;  %v4035_v38 = vcombine.low %v144_v24, %v148_v25  ;;  %v4044_v40 = vcombine.high %v152_v32, %v156_v33  ;;  %v143_v24 = vld [vmem:[#allocation5 + $0xc8] sm:$0xff] }
  0x84   :  { %1102 = vmatpush1.bf16.msra.mxu1 %v4039_v36  ;;  %v178_v52 = vld [vmem:[#allocation5 + $0x1e0] sm:$0xff]  ;;  %v4043_v48 = vcombine.low %v152_v32, %v156_v33  ;;  %v147_v25 = vld [vmem:[#allocation5 + $0xe8] sm:$0xff] }
  0x85   :  { %1103 = vmatprep.subr.bf16.mxu1 %v4048_v37  ;;  %1139 = vmatpush1.bf16.msra.mxu0 %v1070_v41  ;;  %v4064_v57 = vcombine.high %v174_v51, %v178_v52  ;;  %v182_v59 = vld [vmem:[#allocation5 + $0x200] sm:$0xff]  ;;  %v4063_v2 = vcombine.low %v174_v51, %v178_v52  ;;  %v160_v41 = vld [vmem:[#allocation5 + $0x150] sm:$0xff]  ;;  %v151_v32 = vld [vmem:[#allocation5 + $0x108] sm:$0xff] }
  0x86   :  { %1216 = vmatprep.subr.bf16.mxu0 %v4138_v44  ;;  %v186_v60 = vld [vmem:[#allocation5 + $0x220] sm:$0xff]  ;;  %v4052_v51 = vcombine.high %v160_v41, %v164_v42  ;;  %v155_v33 = vld [vmem:[#allocation5 + $0x128] sm:$0xff] }
  0x87   :  { %v4072_v3 = vcombine.high %v182_v59, %v186_v60  ;;  %v190_v4 = vld [vmem:[#allocation5 + $0x240] sm:$0xff]  ;;  %v4071_v10 = vcombine.low %v182_v59, %v186_v60 }
  0x88   :  { %1104 = vmatpush1.bf16.msra.mxu1 %v4047_v46  ;;  %4160 = vmatmul.mubr.msk.bf16.vlgmr.msra.gmra.mrb[0].mxu0 %vm1064_vm1, %v5400_v47  ;;  %v194_v5 = vld [vmem:[#allocation5 + $0x260] sm:$0xff] }
  0x89   :  { %1105 = vmatprep.subr.bf16.mxu1 %v4056_v49  ;;  %1217 = vmatpush1.bf16.msra.mxu0 %v4137_v50  ;;  %v4080_v11 = vcombine.high %v190_v4, %v194_v5  ;;  %v198_v13 = vld [vmem:[#allocation5 + $0x280] sm:$0xff]  ;;  %v4079_v18 = vcombine.low %v190_v4, %v194_v5  ;;  %v168_v49 = vld [vmem:[#allocation5 + $0x190] sm:$0xff]  ;;  %v112_v4 = vld [vmem:[#allocation2] sm:$0xff] }
  0x8a   :  { %1218 = vmatprep.subr.bf16.mxu0 %v4146_v53  ;;  %1248 = vmatprep.mubr.bf16.mxu0 %v5270_v0  ;;  %v202_v14 = vld [vmem:[#allocation5 + $0x2a0] sm:$0xff]  ;;  %v172_v50 = vld [vmem:[#allocation5 + $0x1b0] sm:$0xff] }
  0x8b   :  { %v4088_v19 = vcombine.high %v198_v13, %v202_v14  ;;  %v206_v21 = vld [vmem:[#allocation5 + $0x2c0] sm:$0xff]  ;;  %v4087_v26 = vcombine.low %v198_v13, %v202_v14  ;;  %v4060_v59 = vcombine.high %v168_v49, %v172_v50  ;;  %v4059_v1 = vcombine.low %v168_v49, %v172_v50  ;;  %v167_v50 = vld [vmem:[#allocation5 + $0x188] sm:$0xff] }
  0x8c   :  { %1106 = vmatpush1.bf16.msra.mxu1 %v4055_v56  ;;  %v210_v22 = vld [vmem:[#allocation5 + $0x2e0] sm:$0xff]  ;;  %v4051_v56 = vcombine.low %v160_v41, %v164_v42  ;;  %v5410_v14 = vpack.c.bf16 %v112_v4, %v112_v4  ;;  %v159_v41 = vld [vmem:[#allocation5 + $0x148] sm:$0xff]  ;;  %v4041_v49 = vcombine.low %v151_v32, %v155_v33 }
  0x8d   :  { %1107 = vmatprep.subr.bf16.mxu1 %v4064_v57  ;;  %1219 = vmatpush1.bf16.msra.mxu0 %v4145_v58  ;;  %v4096_v27 = vcombine.high %v206_v21, %v210_v22  ;;  %v214_v29 = vld [vmem:[#allocation5 + $0x300] sm:$0xff]  ;;  %v4095_v34 = vcombine.low %v206_v21, %v210_v22  ;;  %v176_v57 = vld [vmem:[#allocation5 + $0x1d0] sm:$0xff]  ;;  %v163_v42 = vld [vmem:[#allocation5 + $0x168] sm:$0xff] }
  0x8e   :  { %4161 = vmatprep.subr.msk.bf16.mxu0 %vm1068_vm0, %v4154_v61  ;;  %v218_v30 = vld [vmem:[#allocation5 + $0x320] sm:$0xff]  ;;  %v180_v58 = vld [vmem:[#allocation5 + $0x1f0] sm:$0xff]  ;;  %v119_v61 = vld [vmem:[#allocation5 + $0x8] sm:$0xff] }
  0x8f   :  { %v4104_v36 = vcombine.high %v214_v29, %v218_v30  ;;  %v222_v37 = vld [vmem:[#allocation5 + $0x340] sm:$0xff]  ;;  %v4103_v43 = vcombine.low %v214_v29, %v218_v30  ;;  %v4068_v5 = vcombine.high %v176_v57, %v180_v58  ;;  %v4010_v9 = vcombine.high %v119_v61, %v123_v62  ;;  %v204_v21 = vld [vmem:[#allocation5 + $0x2b0] sm:$0xff]  ;;  %v187_v4 = vld [vmem:[#allocation5 + $0x228] sm:$0xff] }
  0x90   :  { %1108 = vmatpush1.bf16.msra.mxu1 %v4063_v2  ;;  %v226_v39 = vld [vmem:[#allocation5 + $0x360] sm:$0xff]  ;;  %v184_v2 = vld [vmem:[#allocation5 + $0x210] sm:$0xff] }
  0x91   :  { %1109 = vmatprep.subr.bf16.mxu1 %v4072_v3  ;;  %1221 = vmatpush1.bf16.msra.mxu0 %v1076_v6  ;;  %v230_v44 = vld [vmem:[#allocation5 + $0x380] sm:$0xff]  ;;  %v4112_v46 = vcombine.high %v222_v37, %v226_v39  ;;  %v4111_v52 = vcombine.low %v222_v37, %v226_v39  ;;  %v188_v3 = vld [vmem:[#allocation5 + $0x230] sm:$0xff] }
  0x92   :  { %1257 = vmatprep.subr.bf16.mxu0 %v4012_v7  ;;  %v234_v45 = vld [vmem:[#allocation5 + $0x3a0] sm:$0xff]  ;;  %v127_v7 = vld [vmem:[#allocation5 + $0x48] sm:$0xff]  ;;  %v4076_v13 = vcombine.high %v184_v2, %v188_v3  ;;  %v212_v29 = vld [vmem:[#allocation5 + $0x2f0] sm:$0xff] }
  0x93   :  { %v238_v53 = vld [vmem:[#allocation5 + $0x3c0] sm:$0xff]  ;;  %v4120_v55 = vcombine.high %v230_v44, %v234_v45  ;;  %v4119_v60 = vcombine.low %v230_v44, %v234_v45  ;;  %v216_v37 = vld [vmem:[#allocation5 + $0x310] sm:$0xff] }
  0x94   :  { %1110 = vmatpush1.bf16.msra.mxu1 %v4071_v10  ;;  %4162 = vmatmul.mubr.msk.bf16.vlgmr.msra.gmra.mrb[4].mxu0 %vm1064_vm1, %v5400_v47  ;;  %v242_v54 = vld [vmem:[#allocation5 + $0x3e0] sm:$0xff]  ;;  %v4067_v10 = vcombine.low %v176_v57, %v180_v58  ;;  %v224_v45 = vld [vmem:[#allocation5 + $0x350] sm:$0xff]  ;;  %v4049_v57 = vcombine.low %v159_v41, %v163_v42  ;;  %v175_v58 = vld [vmem:[#allocation5 + $0x1c8] sm:$0xff] }
  0x95   :  { %1111 = vmatprep.subr.bf16.mxu1 %v4080_v11  ;;  %1258 = vmatpush1.bf16.msra.mxu0 %v4011_v12  ;;  %v4128_v63 = vcombine.high %v238_v53, %v242_v54  ;;  %v4127_v6 = vcombine.low %v238_v53, %v242_v54  ;;  %v192_v11 = vld [vmem:[#allocation5 + $0x250] sm:$0xff] }
  0x96   :  { %1259 = vmatprep.subr.bf16.mxu0 %v4020_v15  ;;  %1289 = vmatprep.mubr.bf16.mxu0 %v5395_v35  ;;  %v196_v12 = vld [vmem:[#allocation5 + $0x270] sm:$0xff]  ;;  %v4009_v15 = vcombine.low %v119_v61, %v123_v62 }
  0x97   :  { %v4084_v22 = vcombine.high %v192_v11, %v196_v12  ;;  %v232_v54 = vld [vmem:[#allocation5 + $0x390] sm:$0xff] }
  0x98   :  { %1112 = vmatpush1.bf16.msra.mxu1 %v4079_v18  ;;  %v4018_v18 = vcombine.high %v127_v7, %v131_v8  ;;  %v240_v62 = vld [vmem:[#allocation5 + $0x3d0] sm:$0xff] }
  0x99   :  { %1113 = vmatprep.subr.bf16.mxu1 %v4088_v19  ;;  %1260 = vmatpush1.bf16.msra.mxu0 %v4019_v20  ;;  %v4075_v19 = vcombine.low %v184_v2, %v188_v3  ;;  %v200_v20 = vld [vmem:[#allocation5 + $0x290] sm:$0xff]  ;;  %v183_v3 = vld [vmem:[#allocation5 + $0x208] sm:$0xff] }
  0x9a   :  { %1261 = vmatprep.subr.bf16.mxu0 %v4028_v23  ;;  %v4017_v23 = vcombine.low %v127_v7, %v131_v8  ;;  %v4092_v30 = vcombine.high %v200_v20, %v204_v21  ;;  %v248_v7 = vld [vmem:[#allocation5 + $0x410] sm:$0xff] }
  0x9b   :  { %v252_v8 = vld [vmem:[#allocation5 + $0x430] sm:$0xff] }
  0x9c   :  { %1114 = vmatpush1.bf16.msra.mxu1 %v4087_v26  ;;  %v4026_v26 = vcombine.high %v135_v16, %v139_v17 }
  0x9d   :  { %1115 = vmatprep.subr.bf16.mxu1 %v4096_v27  ;;  %1262 = vmatpush1.bf16.msra.mxu0 %v4027_v28  ;;  %v4083_v27 = vcombine.low %v192_v11, %v196_v12  ;;  %v208_v28 = vld [vmem:[#allocation5 + $0x2d0] sm:$0xff]  ;;  %v191_v11 = vld [vmem:[#allocation5 + $0x248] sm:$0xff] }
  0x9e   :  { %1263 = vmatprep.subr.bf16.mxu0 %v4036_v31  ;;  %v4025_v31 = vcombine.low %v135_v16, %v139_v17  ;;  %v4100_v39 = vcombine.high %v208_v28, %v212_v29  ;;  %v4099_v44 = vcombine.low %v208_v28, %v212_v29  ;;  %v195_v12 = vld [vmem:[#allocation5 + $0x268] sm:$0xff]  ;;  %v256_v16 = vld [vmem:[#allocation5 + $0x450] sm:$0xff] }
  0x9f   :  { %v260_v17 = vld [vmem:[#allocation5 + $0x470] sm:$0xff]  ;;  %v207_v28 = vld [vmem:[#allocation5 + $0x2c8] sm:$0xff] }
  0xa0   :  { %1116 = vmatpush1.bf16.msra.mxu1 %v4095_v34  ;;  %v4034_v34 = vcombine.high %v143_v24, %v147_v25 }
  0xa1   :  { %1117 = vmatprep.subr.bf16.mxu1 %v4104_v36  ;;  %1264 = vmatpush1.bf16.msra.mxu0 %v4035_v38  ;;  %v4091_v36 = vcombine.low %v200_v20, %v204_v21  ;;  %v220_v38 = vld [vmem:[#allocation5 + $0x330] sm:$0xff]  ;;  %v199_v20 = vld [vmem:[#allocation5 + $0x288] sm:$0xff] }
  0xa2   :  { %1265 = vmatprep.subr.bf16.mxu0 %v4044_v40  ;;  %v4033_v40 = vcombine.low %v143_v24, %v147_v25  ;;  %v4107_v53 = vcombine.low %v216_v37, %v220_v38  ;;  %v203_v21 = vld [vmem:[#allocation5 + $0x2a8] sm:$0xff]  ;;  %v264_v24 = vld [vmem:[#allocation5 + $0x490] sm:$0xff] }
  0xa3   :  { %v268_v25 = vld [vmem:[#allocation5 + $0x4b0] sm:$0x33]  ;;  %v4090_v29 = vcombine.high %v199_v20, %v203_v21 }
  0xa4   :  { %1118 = vmatpush1.bf16.msra.mxu1 %v4103_v43  ;;  %v4042_v43 = vcombine.high %v151_v32, %v155_v33  ;;  %v4156_v32 = vcombine.high %v264_v24, %v268_v25  ;;  %v4155_v33 = vcombine.low %v264_v24, %v268_v25  ;;  %v153_v24 = vld [vmem:[#allocation5 + $0x118] sm:$0xff] }
  0xa5   :  { %1119 = vmatprep.subr.bf16.mxu1 %v4112_v46  ;;  %1266 = vmatpush1.bf16.msra.mxu0 %v4043_v48  ;;  %v228_v46 = vld [vmem:[#allocation5 + $0x370] sm:$0xff]  ;;  %v4108_v48 = vcombine.high %v216_v37, %v220_v38  ;;  %v219_v37 = vld [vmem:[#allocation5 + $0x328] sm:$0xff]  ;;  %v157_v25 = vld [vmem:[#allocation5 + $0x138] sm:$0xff] }
  0xa6   :  { %1267 = vmatprep.subr.bf16.mxu0 %v4052_v51  ;;  %v171_v51 = vld [vmem:[#allocation5 + $0x1a8] sm:$0xff]  ;;  %v4115_v61 = vcombine.low %v224_v45, %v228_v46 }
  0xa7   :  { %v4057_v2 = vcombine.low %v167_v50, %v171_v51 }
  0xa8   :  { %1120 = vmatpush1.bf16.msra.mxu1 %v4111_v52  ;;  %v4050_v52 = vcombine.high %v159_v41, %v163_v42  ;;  %v223_v42 = vld [vmem:[#allocation5 + $0x348] sm:$0xff] }
  0xa9   :  { %1121 = vmatprep.subr.bf16.mxu1 %v4120_v55  ;;  %1268 = vmatpush1.bf16.msra.mxu0 %v4051_v56  ;;  %v236_v55 = vld [vmem:[#allocation5 + $0x3b0] sm:$0xff]  ;;  %v4116_v56 = vcombine.high %v224_v45, %v228_v46  ;;  %v4604_v46 = vld [vmem:[#allocation8 + $0x24] ss:$16 sps:$4 sm:$0xff]  }
  0xaa   :  { %1269 = vmatprep.subr.bf16.mxu0 %v4060_v59  ;;  %v179_v59 = vld [vmem:[#allocation5 + $0x1e8] sm:$0xff] }
  0xac   :  { %1122 = vmatpush1.bf16.msra.mxu1 %v4119_v60  ;;  %v4058_v60 = vcombine.high %v167_v50, %v171_v51  ;;  %v235_v50 = vld [vmem:[#allocation5 + $0x3a8] sm:$0xff] }
  0xad   :  { %1123 = vmatprep.subr.bf16.mxu1 %v4128_v63  ;;  %1270 = vmatpush1.bf16.msra.mxu0 %v4059_v1  ;;  %v244_v63 = vld [vmem:[#allocation5 + $0x3f0] sm:$0xff]  ;;  %v4124_v1 = vcombine.high %v232_v54, %v236_v55  ;;  %v4602_v51 = vld [vmem:[#allocation8 + $0x20] ss:$16 sps:$4 sm:$0xff]  }
  0xae   :  { %1271 = vmatprep.subr.bf16.mxu0 %v4068_v5  ;;  %v4066_v5 = vcombine.high %v175_v58, %v179_v59 }
  0xb0   :  { %1124 = vmatpush1.bf16.msra.mxu1 %v4127_v6  ;;  %v4123_v6 = vcombine.low %v232_v54, %v236_v55  ;;  %v239_v55 = vld [vmem:[#allocation5 + $0x3c8] sm:$0xff] }
  0xb1   :  { %1175 = vmatprep.subr.bf16.mxu1 %v4010_v9  ;;  %1272 = vmatpush1.bf16.msra.mxu0 %v4067_v10  ;;  %v4132_v9 = vcombine.high %v240_v62, %v244_v63  ;;  %v4065_v10 = vcombine.low %v175_v58, %v179_v59  ;;  %v4616_v59 = vld [vmem:[#allocation8 + $0x64] ss:$16 sps:$4 sm:$0xff]  }
  0xb2   :  { %1273 = vmatprep.subr.bf16.mxu0 %v4076_v13  ;;  %v4074_v13 = vcombine.high %v183_v3, %v187_v4 }
  0xb3   :  { %1126 = vmatmul.mubr.bf16.vlgmr.msra.gmra.mrb[0].mxu1 %v5410_v14 }
  0xb4   :  { %1176 = vmatpush1.bf16.msra.mxu1 %v4009_v15  ;;  %1207 = vmatprep.mubr.bf16.mxu1 %v5395_v35  ;;  %v4131_v15 = vcombine.low %v240_v62, %v244_v63  ;;  %v125_v62 = vld [vmem:[#allocation5 + $0x38] sm:$0xff] }
  0xb5   :  { %1177 = vmatprep.subr.bf16.mxu1 %v4018_v18  ;;  %1274 = vmatpush1.bf16.msra.mxu0 %v4075_v19  ;;  %v4140_v18 = vcombine.high %v248_v7, %v252_v8  ;;  %v4073_v19 = vcombine.low %v183_v3, %v187_v4  ;;  %v4614_v63 = vld [vmem:[#allocation8 + $0x60] ss:$16 sps:$4 sm:$0xff]  }
  0xb6   :  { %1275 = vmatprep.subr.bf16.mxu0 %v4084_v22  ;;  %v4082_v22 = vcombine.high %v191_v11, %v195_v12  ;;  %v129_v4 = vld [vmem:[#allocation5 + $0x58] sm:$0xff] }
  0xb8   :  { %1178 = vmatpush1.bf16.msra.mxu1 %v4017_v23  ;;  %v4139_v23 = vcombine.low %v248_v7, %v252_v8  ;;  %v4628_v8 = vld [vmem:[#allocation8 + $0xa4] ss:$16 sps:$4 sm:$0xff]  }
  0xb9   :  { %1179 = vmatprep.subr.bf16.mxu1 %v4026_v26  ;;  %1276 = vmatpush1.bf16.msra.mxu0 %v4083_v27  ;;  %v4148_v26 = vcombine.high %v256_v16, %v260_v17  ;;  %v4081_v27 = vcombine.low %v191_v11, %v195_v12  ;;  %v141_v11 = vld [vmem:[#allocation5 + $0xb8] sm:$0xff] }
  0xba   :  { %1277 = vmatprep.subr.bf16.mxu0 %v4092_v30  ;;  %v211_v30 = vld [vmem:[#allocation5 + $0x2e8] sm:$0xff] }
  0xbb   :  { %v4098_v38 = vcombine.high %v207_v28, %v211_v30  ;;  %v4097_v41 = vcombine.low %v207_v28, %v211_v30  ;;  %v4626_v12 = vld [vmem:[#allocation8 + $0xa0] ss:$16 sps:$4 sm:$0xff]  }
  0xbc   :  { %1180 = vmatpush1.bf16.msra.mxu1 %v4025_v31  ;;  %v4147_v31 = vcombine.low %v256_v16, %v260_v17  ;;  %v4632_v16 = vld [vmem:[#allocation8 + $0xc0] ss:$16 sps:$4 sm:$0xff]  }
  0xbd   :  { %1181 = vmatprep.subr.bf16.mxu1 %v4034_v34  ;;  %1278 = vmatpush1.bf16.msra.mxu0 %v4091_v36  ;;  %v4089_v34 = vcombine.low %v199_v20, %v203_v21  ;;  %v215_v36 = vld [vmem:[#allocation5 + $0x308] sm:$0xff]  ;;  %v161_v30 = vld [vmem:[#allocation5 + $0x158] sm:$0xff] }
  0xbe   :  { %1279 = vmatprep.subr.bf16.mxu0 %v4100_v39  ;;  %v4598_v39 = vld [vmem:[#allocation8 + $0x4] ss:$16 sps:$4 sm:$0xff]   ;;  %v4106_v45 = vcombine.high %v215_v36, %v219_v37  ;;  %v4644_v28 = vld [vmem:[#allocation8 + $0x100] ss:$16 sps:$4 sm:$0xff]  }
  0xbf   :  { %v4640_v20 = vld [vmem:[#allocation8 + $0xe4] ss:$16 sps:$4 sm:$0xff]  }
  0xc0   :  { %1182 = vmatpush1.bf16.msra.mxu1 %v4033_v40  ;;  %v1082_v40 = vsel %vm1068_vm0, %v4155_v33, 0  ;;  %v4650_v33 = vld [vmem:[#allocation8 + $0x120] ss:$16 sps:$4 sm:$0xff]  }
  0xc1   :  { %1183 = vmatprep.subr.bf16.mxu1 %v4042_v43  ;;  %1280 = vmatpush1.bf16.msra.mxu0 %v4099_v44  ;;  %v227_v43 = vld [vmem:[#allocation5 + $0x368] sm:$0xff] }
  0xc2   :  { %1281 = vmatprep.subr.bf16.mxu0 %v4108_v48  ;;  %v4596_v44 = vld [vmem:[#allocation8] ss:$16 sps:$4 sm:$0xff]   ;;  %v4105_v48 = vcombine.low %v215_v36, %v219_v37  ;;  %v4113_v54 = vcombine.low %v223_v42, %v227_v43 }
  0xc3   :  { %v169_v36 = vld [vmem:[#allocation5 + $0x198] sm:$0xff] }
  0xc4   :  { %1184 = vmatpush1.bf16.msra.mxu1 %v4041_v49  ;;  %v231_v49 = vld [vmem:[#allocation5 + $0x388] sm:$0xff]  ;;  %v173_v37 = vld [vmem:[#allocation5 + $0x1b8] sm:$0xff] }
  0xc5   :  { %1185 = vmatprep.subr.bf16.mxu1 %v4050_v52  ;;  %1282 = vmatpush1.bf16.msra.mxu0 %v4107_v53  ;;  %v4114_v52 = vcombine.high %v223_v42, %v227_v43  ;;  %v4610_v53 = vld [vmem:[#allocation8 + $0x44] ss:$16 sps:$4 sm:$0xff]   ;;  %v4122_v58 = vcombine.high %v231_v49, %v235_v50  ;;  %v4062_v43 = vcombine.high %v169_v36, %v173_v37 }
  0xc6   :  { %1283 = vmatprep.subr.bf16.mxu0 %v4116_v56  ;;  %v243_v56 = vld [vmem:[#allocation5 + $0x3e8] sm:$0xff]  ;;  %v177_v42 = vld [vmem:[#allocation5 + $0x1d8] sm:$0xff] }
  0xc7   :  { %v4129_v3 = vcombine.low %v239_v55, %v243_v56 }
  0xc8   :  { %1186 = vmatpush1.bf16.msra.mxu1 %v4049_v57  ;;  %v4608_v57 = vld [vmem:[#allocation8 + $0x40] ss:$16 sps:$4 sm:$0xff]  }
  0xc9   :  { %1187 = vmatprep.subr.bf16.mxu1 %v4058_v60  ;;  %1284 = vmatpush1.bf16.msra.mxu0 %v4115_v61  ;;  %v4121_v60 = vcombine.low %v231_v49, %v235_v50  ;;  %v121_v61 = vld [vmem:[#allocation5 + $0x18] sm:$0xff] }
  0xca   :  { %1285 = vmatprep.subr.bf16.mxu0 %v4124_v1  ;;  %v4130_v1 = vcombine.high %v239_v55, %v243_v56  ;;  %v4014_v7 = vcombine.high %v121_v61, %v125_v62  ;;  %v185_v49 = vld [vmem:[#allocation5 + $0x218] sm:$0xff] }
  0xcb   :  { %v193_v55 = vld [vmem:[#allocation5 + $0x258] sm:$0xff] }
  0xcc   :  { %1188 = vmatpush1.bf16.msra.mxu1 %v4057_v2  ;;  %v4622_v2 = vld [vmem:[#allocation8 + $0x84] ss:$16 sps:$4 sm:$0xff]  }
  0xcd   :  { %1189 = vmatprep.subr.bf16.mxu1 %v4066_v5  ;;  %1286 = vmatpush1.bf16.msra.mxu0 %v4123_v6  ;;  %v133_v5 = vld [vmem:[#allocation5 + $0x78] sm:$0xff] }
  0xce   :  { %1287 = vmatprep.subr.bf16.mxu0 %v4132_v9  ;;  %v4620_v6 = vld [vmem:[#allocation8 + $0x80] ss:$16 sps:$4 sm:$0xff]   ;;  %v4013_v9 = vcombine.low %v121_v61, %v125_v62  ;;  %v4021_v17 = vcombine.low %v129_v4, %v133_v5 }
  0xcf   :  { %v201_v61 = vld [vmem:[#allocation5 + $0x298] sm:$0xff] }
  0xd0   :  { %1190 = vmatpush1.bf16.msra.mxu1 %v4065_v10  ;;  %v137_v10 = vld [vmem:[#allocation5 + $0x98] sm:$0xff] }
  0xd1   :  { %1191 = vmatprep.subr.bf16.mxu1 %v4074_v13  ;;  %1288 = vmatpush1.bf16.msra.mxu0 %v4131_v15  ;;  %v4022_v13 = vcombine.high %v129_v4, %v133_v5  ;;  %v4634_v15 = vld [vmem:[#allocation8 + $0xc4] ss:$16 sps:$4 sm:$0xff]   ;;  %v4030_v21 = vcombine.high %v137_v10, %v141_v11 }
  0xd2   :  { %1298 = vmatprep.subr.bf16.mxu0 %v4140_v18  ;;  %v145_v18 = vld [vmem:[#allocation5 + $0xd8] sm:$0xff] }
  0xd3   :  { %v209_v4 = vld [vmem:[#allocation5 + $0x2d8] sm:$0xff] }
  0xd4   :  { %1192 = vmatpush1.bf16.msra.mxu1 %v4073_v19  ;;  %1290 = vmatmul.mubr.bf16.vlgmr.msra.gmra.mrb[8].mxu0 %v5410_v14  ;;  %v149_v19 = vld [vmem:[#allocation5 + $0xf8] sm:$0xff] }
  0xd5   :  { %1193 = vmatprep.subr.bf16.mxu1 %v4082_v22  ;;  %1299 = vmatpush1.bf16.msra.mxu0 %v4139_v23  ;;  %v4638_v22 = vld [vmem:[#allocation8 + $0xe0] ss:$16 sps:$4 sm:$0xff]   ;;  %v4029_v23 = vcombine.low %v137_v10, %v141_v11 }
  0xd6   :  { %1300 = vmatprep.subr.bf16.mxu0 %v4148_v26  ;;  %1330 = vmatprep.mubr.bf16.mxu0 %v5270_v0  ;;  %v4646_v26 = vld [vmem:[#allocation8 + $0x104] ss:$16 sps:$4 sm:$0xff]  }
  0xd7   :  { %v217_v10 = vld [vmem:[#allocation5 + $0x318] sm:$0xff] }
  0xd8   :  { %1194 = vmatpush1.bf16.msra.mxu1 %v4081_v27  ;;  %v4038_v27 = vcombine.high %v145_v18, %v149_v19 }
  0xd9   :  { %1195 = vmatprep.subr.bf16.mxu1 %v4090_v29  ;;  %1301 = vmatpush1.bf16.msra.mxu0 %v4147_v31  ;;  %v4037_v29 = vcombine.low %v145_v18, %v149_v19  ;;  %v4652_v31 = vld [vmem:[#allocation8 + $0x124] ss:$16 sps:$4 sm:$0xff]  }
  0xda   :  { %4163 = vmatprep.subr.msk.bf16.mxu0 %vm1068_vm0, %v4156_v32  ;;  %v4046_v32 = vcombine.high %v153_v24, %v157_v25  ;;  %v229_v18 = vld [vmem:[#allocation5 + $0x378] sm:$0xff] }
  0xdc   :  { %1196 = vmatpush1.bf16.msra.mxu1 %v4089_v34  ;;  %v4045_v34 = vcombine.low %v153_v24, %v157_v25  ;;  %v241_v25 = vld [vmem:[#allocation5 + $0x3d8] sm:$0xff] }
  0xdd   :  { %1197 = vmatprep.subr.bf16.mxu1 %v4098_v38  ;;  %1303 = vmatpush1.bf16.msra.mxu0 %v1082_v40  ;;  %v4658_v38 = vld [vmem:[#allocation8 + $0x144] ss:$16 sps:$4 sm:$0xff]   ;;  %v4656_v40 = vld [vmem:[#allocation8 + $0x140] ss:$16 sps:$4 sm:$0xff]  }
  0xde   :  { %2995 = vmatprep.subr.bf16.mxu0 %v4598_v39 }
  0xe0   :  { %1198 = vmatpush1.bf16.msra.mxu1 %v4097_v41  ;;  %4164 = vmatmul.mubr.msk.bf16.vlgmr.msra.gmra.mrb[8].mxu0 %vm1064_vm1, %v5400_v47 }
  0xe1   :  { %1199 = vmatprep.subr.bf16.mxu1 %v4106_v45  ;;  %2996 = vmatpush1.bf16.msra.mxu0 %v4596_v44  ;;  %v181_v44 = vld [vmem:[#allocation5 + $0x1f8] sm:$0xff] }
  0xe2   :  { %2997 = vmatprep.subr.bf16.mxu0 %v4604_v46  ;;  %v4664_v45 = vld [vmem:[#allocation8 + $0x164] ss:$16 sps:$4 sm:$0xff]   ;;  %v4662_v46 = vld [vmem:[#allocation8 + $0x160] ss:$16 sps:$4 sm:$0xff]   ;;  %v4070_v50 = vcombine.high %v177_v42, %v181_v44 }
  0xe4   :  { %1200 = vmatpush1.bf16.msra.mxu1 %v4105_v48  ;;  %v4061_v48 = vcombine.low %v169_v36, %v173_v37  ;;  %v269_v36 = vld [vmem:[#allocation5 + $0x4b8] sm:$0x33] }
  0xe5   :  { %1201 = vmatprep.subr.bf16.mxu1 %v4114_v52  ;;  %2998 = vmatpush1.bf16.msra.mxu0 %v4602_v51  ;;  %v189_v51 = vld [vmem:[#allocation5 + $0x238] sm:$0xff] }
  0xe6   :  { %2999 = vmatprep.subr.bf16.mxu0 %v4610_v53  ;;  %v4670_v52 = vld [vmem:[#allocation8 + $0x184] ss:$16 sps:$4 sm:$0xff]   ;;  %v4668_v53 = vld [vmem:[#allocation8 + $0x180] ss:$16 sps:$4 sm:$0xff]   ;;  %v4078_v56 = vcombine.high %v185_v49, %v189_v51 }
  0xe8   :  { %1202 = vmatpush1.bf16.msra.mxu1 %v4113_v54  ;;  %v4069_v54 = vcombine.low %v177_v42, %v181_v44  ;;  %v4599_v44 = vld [vmem:[#allocation8 + $0x8] ss:$16 sps:$4 sm:$0xff]  }
  0xe9   :  { %1203 = vmatprep.subr.bf16.mxu1 %v4122_v58  ;;  %3000 = vmatpush1.bf16.msra.mxu0 %v4608_v57  ;;  %v197_v57 = vld [vmem:[#allocation5 + $0x278] sm:$0xff] }
  0xea   :  { %3001 = vmatprep.subr.bf16.mxu0 %v4616_v59  ;;  %v4676_v58 = vld [vmem:[#allocation8 + $0x1a4] ss:$16 sps:$4 sm:$0xff]   ;;  %v4674_v59 = vld [vmem:[#allocation8 + $0x1a0] ss:$16 sps:$4 sm:$0xff]   ;;  %v4086_v62 = vcombine.high %v193_v55, %v197_v57 }
  0xec   :  { %1204 = vmatpush1.bf16.msra.mxu1 %v4121_v60  ;;  %v4077_v60 = vcombine.low %v185_v49, %v189_v51  ;;  %v4617_v49 = vld [vmem:[#allocation8 + $0x68] ss:$16 sps:$4 sm:$0xff]  }
  0xed   :  { %1205 = vmatprep.subr.bf16.mxu1 %v4130_v1  ;;  %3002 = vmatpush1.bf16.msra.mxu0 %v4614_v63  ;;  %v205_v63 = vld [vmem:[#allocation5 + $0x2b8] sm:$0xff]  ;;  %v4623_v51 = vld [vmem:[#allocation8 + $0x88] ss:$16 sps:$4 sm:$0xff]  }
  0xee   :  { %3003 = vmatprep.subr.bf16.mxu0 %v4622_v2  ;;  %v4682_v1 = vld [vmem:[#allocation8 + $0x1c4] ss:$16 sps:$4 sm:$0xff]   ;;  %v4680_v2 = vld [vmem:[#allocation8 + $0x1c0] ss:$16 sps:$4 sm:$0xff]   ;;  %v4094_v5 = vcombine.high %v201_v61, %v205_v63 }
  0xf0   :  { %1206 = vmatpush1.bf16.msra.mxu1 %v4129_v3  ;;  %v4085_v3 = vcombine.low %v193_v55, %v197_v57  ;;  %v4643_v55 = vld [vmem:[#allocation8 + $0xec] ss:$16 sps:$4 sm:$0xff]  }
  0xf1   :  { %1339 = vmatprep.subr.bf16.mxu1 %v4014_v7  ;;  %3004 = vmatpush1.bf16.msra.mxu0 %v4620_v6  ;;  %v213_v6 = vld [vmem:[#allocation5 + $0x2f8] sm:$0xff]  ;;  %v4649_v57 = vld [vmem:[#allocation8 + $0x10c] ss:$16 sps:$4 sm:$0xff]  }
  0xf2   :  { %3005 = vmatprep.subr.bf16.mxu0 %v4628_v8  ;;  %v4688_v7 = vld [vmem:[#allocation8 + $0x1e4] ss:$16 sps:$4 sm:$0xff]   ;;  %v4686_v8 = vld [vmem:[#allocation8 + $0x1e0] ss:$16 sps:$4 sm:$0xff]   ;;  %v4102_v11 = vcombine.high %v209_v4, %v213_v6 }
  0xf3   :  { %1208 = vmatmul.mubr.bf16.vlgmr.msra.gmra.mrb[4].mxu1 %v5410_v14 }
  0xf4   :  { %1340 = vmatpush1.bf16.msra.mxu1 %v4013_v9  ;;  %1371 = vmatprep.mubr.bf16.mxu1 %v5395_v35  ;;  %v165_v35 = vld [vmem:[#allocation5 + $0x178] sm:$0xff]  ;;  %v4093_v9 = vcombine.low %v201_v61, %v205_v63  ;;  %v4655_v61 = vld [vmem:[#allocation8 + $0x12c] ss:$16 sps:$4 sm:$0xff]  }
  0xf5   :  { %1341 = vmatprep.subr.bf16.mxu1 %v4022_v13  ;;  %3006 = vmatpush1.bf16.msra.mxu0 %v4626_v12  ;;  %v4054_v39 = vcombine.high %v161_v30, %v165_v35  ;;  %v4053_v41 = vcombine.low %v161_v30, %v165_v35  ;;  %v221_v12 = vld [vmem:[#allocation5 + $0x338] sm:$0xff] }
  0xf6   :  { %3007 = vmatprep.subr.bf16.mxu0 %v4634_v15  ;;  %v4694_v13 = vld [vmem:[#allocation8 + $0x204] ss:$16 sps:$4 sm:$0xff]   ;;  %v4101_v15 = vcombine.low %v209_v4, %v213_v6  ;;  %v4109_v19 = vcombine.low %v217_v10, %v221_v12  ;;  %v4667_v4 = vld [vmem:[#allocation8 + $0x16c] ss:$16 sps:$4 sm:$0xff]   ;;  %v4665_v6 = vld [vmem:[#allocation8 + $0x168] ss:$16 sps:$4 sm:$0xff]  }
  0xf7   :  { %v253_v30 = vld [vmem:[#allocation5 + $0x438] sm:$0xff] }
  0xf8   :  { %1342 = vmatpush1.bf16.msra.mxu1 %v4021_v17  ;;  %v225_v17 = vld [vmem:[#allocation5 + $0x358] sm:$0xff] }
  0xf9   :  { %1343 = vmatprep.subr.bf16.mxu1 %v4030_v21  ;;  %3008 = vmatpush1.bf16.msra.mxu0 %v4632_v16  ;;  %v4110_v16 = vcombine.high %v217_v10, %v221_v12  ;;  %v233_v21 = vld [vmem:[#allocation5 + $0x398] sm:$0xff]  ;;  %v4679_v12 = vld [vmem:[#allocation8 + $0x1ac] ss:$16 sps:$4 sm:$0xff]  }
  0xfa   :  { %3009 = vmatprep.subr.bf16.mxu0 %v4640_v20  ;;  %v4118_v20 = vcombine.high %v225_v17, %v229_v18 }
  0xfc   :  { %1344 = vmatpush1.bf16.msra.mxu1 %v4029_v23  ;;  %v4117_v23 = vcombine.low %v225_v17, %v229_v18  ;;  %v4691_v17 = vld [vmem:[#allocation8 + $0x1ec] ss:$16 sps:$4 sm:$0xff]   ;;  %v272_v18 = vlaneseq }
  0xfd   :  { %1345 = vmatprep.subr.bf16.mxu1 %v4038_v27  ;;  %3010 = vmatpush1.bf16.msra.mxu0 %v4638_v22  ;;  %v237_v22 = vld [vmem:[#allocation5 + $0x3b8] sm:$0xff] }
  0xfe   :  { %3011 = vmatprep.subr.bf16.mxu0 %v4646_v26  ;;  %v4126_v24 = vcombine.high %v233_v21, %v237_v22  ;;  %v245_v26 = vld [vmem:[#allocation5 + $0x3f8] sm:$0xff]  ;;  %v4125_v27 = vcombine.low %v233_v21, %v237_v22  ;;  %v5432_v21 = vshrl.u32 %v272_v18, 7 }
  0xff   :  { %v4133_v35 = vcombine.low %v241_v25, %v245_v26 }
 0x100   :  { %1346 = vmatpush1.bf16.msra.mxu1 %v4037_v29  ;;  %v249_v29 = vld [vmem:[#allocation5 + $0x418] sm:$0xff]  ;;  %v5435_v22 = vsub.s32 0, %v5432_v21 }
 0x101   :  { %1347 = vmatprep.subr.bf16.mxu1 %v4046_v32  ;;  %3012 = vmatpush1.bf16.msra.mxu0 %v4644_v28  ;;  %v4134_v28 = vcombine.high %v241_v25, %v245_v26  ;;  %v257_v32 = vld [vmem:[#allocation5 + $0x458] sm:$0xff]  ;;  %v4141_v37 = vcombine.low %v249_v29, %v253_v30 }
 0x102   :  { %3013 = vmatprep.subr.bf16.mxu0 %v4652_v31  ;;  %v4142_v31 = vcombine.high %v249_v29, %v253_v30 }
 0x104   :  { %1348 = vmatpush1.bf16.msra.mxu1 %v4045_v34  ;;  %v265_v34 = vld [vmem:[#allocation5 + $0x498] sm:$0xff] }
 0x105   :  { %1349 = vmatprep.subr.bf16.mxu1 %v4054_v39  ;;  %3014 = vmatpush1.bf16.msra.mxu0 %v4650_v33  ;;  %v261_v33 = vld [vmem:[#allocation5 + $0x478] sm:$0xff]  ;;  %v4157_v39 = vcombine.low %v265_v34, %v269_v36 }
 0x106   :  { %3015 = vmatprep.subr.bf16.mxu0 %v4658_v38  ;;  %v4150_v38 = vcombine.high %v257_v32, %v261_v33 }
 0x107   :  { %v1088_v42 = vsel %vm1068_vm0, %v4157_v39, 0  ;;  %v4695_v39 = vld [vmem:[#allocation8 + $0x208] ss:$16 sps:$4 sm:$0xff]  }
 0x108   :  { %1350 = vmatpush1.bf16.msra.mxu1 %v4053_v41  ;;  %v4158_v41 = vcombine.high %v265_v34, %v269_v36 }
 0x109   :  { %1351 = vmatprep.subr.bf16.mxu1 %v4062_v43  ;;  %3016 = vmatpush1.bf16.msra.mxu0 %v4656_v40  ;;  %v4149_v40 = vcombine.low %v257_v32, %v261_v33  ;;  %v4601_v43 = vld [vmem:[#allocation8 + $0xc] ss:$16 sps:$4 sm:$0xff]  }
 0x10a   :  { %3017 = vmatprep.subr.bf16.mxu0 %v4664_v45  ;;  %v4607_v45 = vld [vmem:[#allocation8 + $0x2c] ss:$16 sps:$4 sm:$0xff]  }
 0x10c   :  { %1352 = vmatpush1.bf16.msra.mxu1 %v4061_v48  ;;  %v4619_v48 = vld [vmem:[#allocation8 + $0x6c] ss:$16 sps:$4 sm:$0xff]  }
 0x10d   :  { %1353 = vmatprep.subr.bf16.mxu1 %v4070_v50  ;;  %3018 = vmatpush1.bf16.msra.mxu0 %v4662_v46  ;;  %v4613_v46 = vld [vmem:[#allocation8 + $0x4c] ss:$16 sps:$4 sm:$0xff]  }
 0x10e   :  { %3019 = vmatprep.subr.bf16.mxu0 %v4670_v52  ;;  %v4625_v50 = vld [vmem:[#allocation8 + $0x8c] ss:$16 sps:$4 sm:$0xff]  }
 0x10f   :  { %v4631_v52 = vld [vmem:[#allocation8 + $0xac] ss:$16 sps:$4 sm:$0xff]  }
 0x110   :  { %1354 = vmatpush1.bf16.msra.mxu1 %v4069_v54  ;;  %v4635_v54 = vld [vmem:[#allocation8 + $0xc8] ss:$16 sps:$4 sm:$0xff]  }
 0x111   :  { %1355 = vmatprep.subr.bf16.mxu1 %v4078_v56  ;;  %3020 = vmatpush1.bf16.msra.mxu0 %v4668_v53  ;;  %v4629_v53 = vld [vmem:[#allocation8 + $0xa8] ss:$16 sps:$4 sm:$0xff]  }
 0x112   :  { %3021 = vmatprep.subr.bf16.mxu0 %v4676_v58  ;;  %v4641_v56 = vld [vmem:[#allocation8 + $0xe8] ss:$16 sps:$4 sm:$0xff]  }
 0x114   :  { %1356 = vmatpush1.bf16.msra.mxu1 %v4077_v60 }
 0x115   :  { %1357 = vmatprep.subr.bf16.mxu1 %v4086_v62  ;;  %3022 = vmatpush1.bf16.msra.mxu0 %v4674_v59  ;;  %v4647_v59 = vld [vmem:[#allocation8 + $0x108] ss:$16 sps:$4 sm:$0xff]  }
 0x116   :  { %3023 = vmatprep.subr.bf16.mxu0 %v4682_v1  ;;  %v4653_v1 = vld [vmem:[#allocation8 + $0x128] ss:$16 sps:$4 sm:$0xff]  }
 0x118   :  { %1358 = vmatpush1.bf16.msra.mxu1 %v4085_v3  ;;  %v4659_v3 = vld [vmem:[#allocation8 + $0x148] ss:$16 sps:$4 sm:$0xff]  }
 0x119   :  { %1359 = vmatprep.subr.bf16.mxu1 %v4094_v5  ;;  %3024 = vmatpush1.bf16.msra.mxu0 %v4680_v2  ;;  %v4661_v2 = vld [vmem:[#allocation8 + $0x14c] ss:$16 sps:$4 sm:$0xff]  }
 0x11a   :  { %3025 = vmatprep.subr.bf16.mxu0 %v4688_v7 }
 0x11c   :  { %1360 = vmatpush1.bf16.msra.mxu1 %v4093_v9 }
 0x11d   :  { %1361 = vmatprep.subr.bf16.mxu1 %v4102_v11  ;;  %3026 = vmatpush1.bf16.msra.mxu0 %v4686_v8  ;;  %v4673_v8 = vld [vmem:[#allocation8 + $0x18c] ss:$16 sps:$4 sm:$0xff]   ;;  %v4671_v11 = vld [vmem:[#allocation8 + $0x188] ss:$16 sps:$4 sm:$0xff]  }
 0x11e   :  { %3036 = vmatprep.subr.bf16.mxu0 %v4694_v13  ;;  %v4677_v13 = vld [vmem:[#allocation8 + $0x1a8] ss:$16 sps:$4 sm:$0xff]  }
 0x120   :  { %1362 = vmatpush1.bf16.msra.mxu1 %v4101_v15  ;;  %v4685_v15 = vld [vmem:[#allocation8 + $0x1cc] ss:$16 sps:$4 sm:$0xff]  }
 0x121   :  { %1363 = vmatprep.subr.bf16.mxu1 %v4110_v16  ;;  %v4683_v16 = vld [vmem:[#allocation8 + $0x1c8] ss:$16 sps:$4 sm:$0xff]  }
 0x124   :  { %1364 = vmatpush1.bf16.msra.mxu1 %v4109_v19  ;;  %v4689_v19 = vld [vmem:[#allocation8 + $0x1e8] ss:$16 sps:$4 sm:$0xff]  }
 0x125   :  { %1365 = vmatprep.subr.bf16.mxu1 %v4118_v20  ;;  %v4697_v20 = vld [vmem:[#allocation8 + $0x20c] ss:$16 sps:$4 sm:$0xff]  }
 0x128   :  { %1366 = vmatpush1.bf16.msra.mxu1 %v4117_v23  ;;  %v5437_v23 = vld [vmem:[#allocation7] sm:$0xff] }
 0x129   :  { %1367 = vmatprep.subr.bf16.mxu1 %v4126_v24  ;;  %v5440_v24 = vsub.s32 1, %v5432_v21  ;;  %v275_v25 = vrot.slane %v5437_v23, %v5435_v22 }
 0x12b   :  { %v279_v26 = vrot.slane %v5437_v23, %v5440_v24 }
 0x12c   :  { %1368 = vmatpush1.bf16.msra.mxu1 %v4125_v27 }
 0x12d   :  { %1369 = vmatprep.subr.bf16.mxu1 %v4134_v28 }
 0x130   :  { %1370 = vmatpush1.bf16.msra.mxu1 %v4133_v35 }
 0x131   :  { %1380 = vmatprep.subr.bf16.mxu1 %v4142_v31 }
 0x133   :  { %1372 = vmatmul.mubr.bf16.vlgmr.msra.gmra.mrb[8].mxu1 %v5410_v14  ;;  %v4605_v14 = vld [vmem:[#allocation8 + $0x28] ss:$16 sps:$4 sm:$0xff]  }
 0x134   :  { %1381 = vmatpush1.bf16.msra.mxu1 %v4141_v37  ;;  %1412 = vmatprep.mubr.bf16.mxu1 %v5270_v0  ;;  %v4611_v0 = vld [vmem:[#allocation8 + $0x48] ss:$16 sps:$4 sm:$0xff]  }
 0x135   :  { %1382 = vmatprep.subr.bf16.mxu1 %v4150_v38  ;;  %v4692_v38 = vld [vmem:[#allocation8 + $0x200] ss:$16 sps:$4 sm:$0xff]  }
 0x138   :  { %1383 = vmatpush1.bf16.msra.mxu1 %v4149_v40 }
 0x139   :  { %4165 = vmatprep.subr.msk.bf16.mxu1 %vm1068_vm0, %v4158_v41  ;;  %v4700_v41 = vld [vmem:[#allocation8 + $0x224] ss:$16 sps:$4 sm:$0xff]  }
 0x13c   :  { %1385 = vmatpush1.bf16.msra.mxu1 %v1088_v42  ;;  %v4703_v42 = vld [vmem:[#allocation8 + $0x22c] ss:$16 sps:$4 sm:$0xff]  }
 0x13d   :  { %3159 = vmatprep.subr.bf16.mxu1 %v4601_v43  ;;  %v4698_v43 = vld [vmem:[#allocation8 + $0x220] ss:$16 sps:$4 sm:$0xff]  }
 0x13f   :  { %4166 = vmatmul.mubr.msk.bf16.vlgmr.msra.gmra.mrb[8].mxu1 %vm1064_vm1, %v5400_v47  ;;  %v4637_v47 = vld [vmem:[#allocation8 + $0xcc] ss:$16 sps:$4 sm:$0xff]  }
 0x140   :  { %3160 = vmatpush1.bf16.msra.mxu1 %v4599_v44  ;;  %v4701_v44 = vld [vmem:[#allocation8 + $0x228] ss:$16 sps:$4 sm:$0xff]  }
 0x141   :  { %3161 = vmatprep.subr.bf16.mxu1 %v4607_v45  ;;  %v4706_v45 = vld [vmem:[#allocation8 + $0x244] ss:$16 sps:$4 sm:$0xff]  }
 0x144   :  { %3162 = vmatpush1.bf16.msra.mxu1 %v4605_v14  ;;  %v4709_v14 = vld [vmem:[#allocation8 + $0x24c] ss:$16 sps:$4 sm:$0xff]  }
 0x145   :  { %3163 = vmatprep.subr.bf16.mxu1 %v4613_v46  ;;  %v4704_v46 = vld [vmem:[#allocation8 + $0x240] ss:$16 sps:$4 sm:$0xff]  }
 0x148   :  { %3164 = vmatpush1.bf16.msra.mxu1 %v4611_v0  ;;  %v4707_v0 = vld [vmem:[#allocation8 + $0x248] ss:$16 sps:$4 sm:$0xff]  }
 0x149   :  { %3165 = vmatprep.subr.bf16.mxu1 %v4619_v48  ;;  %v4712_v48 = vld [vmem:[#allocation8 + $0x264] ss:$16 sps:$4 sm:$0xff]  }
 0x14c   :  { %3166 = vmatpush1.bf16.msra.mxu1 %v4617_v49  ;;  %v4715_v49 = vld [vmem:[#allocation8 + $0x26c] ss:$16 sps:$4 sm:$0xff]  }
 0x14d   :  { %3167 = vmatprep.subr.bf16.mxu1 %v4625_v50  ;;  %v4710_v50 = vld [vmem:[#allocation8 + $0x260] ss:$16 sps:$4 sm:$0xff]  }
 0x150   :  { %3168 = vmatpush1.bf16.msra.mxu1 %v4623_v51  ;;  %v4713_v51 = vld [vmem:[#allocation8 + $0x268] ss:$16 sps:$4 sm:$0xff]  }
 0x151   :  { %3169 = vmatprep.subr.bf16.mxu1 %v4631_v52  ;;  %v4718_v52 = vld [vmem:[#allocation8 + $0x284] ss:$16 sps:$4 sm:$0xff]  }
 0x154   :  { %3170 = vmatpush1.bf16.msra.mxu1 %v4629_v53  ;;  %v4721_v53 = vld [vmem:[#allocation8 + $0x28c] ss:$16 sps:$4 sm:$0xff]  }
 0x155   :  { %3171 = vmatprep.subr.bf16.mxu1 %v4637_v47  ;;  %v4716_v47 = vld [vmem:[#allocation8 + $0x280] ss:$16 sps:$4 sm:$0xff]  }
 0x158   :  { %3172 = vmatpush1.bf16.msra.mxu1 %v4635_v54  ;;  %v4719_v54 = vld [vmem:[#allocation8 + $0x288] ss:$16 sps:$4 sm:$0xff]  }
 0x159   :  { %3173 = vmatprep.subr.bf16.mxu1 %v4643_v55  ;;  %v4724_v55 = vld [vmem:[#allocation8 + $0x2a4] ss:$16 sps:$4 sm:$0xff]  }
 0x15b   :  { %v1168_v58 = vpop.f32.mrb[0].mxu0 }
 0x15c   :  { %3174 = vmatpush1.bf16.msra.mxu1 %v4641_v56  ;;  %v1170_v60 = vpop.f32.mrb[1].mxu0  ;;  %v4727_v56 = vld [vmem:[#allocation8 + $0x2ac] ss:$16 sps:$4 sm:$0xff]  }
 0x15d   :  { %3175 = vmatprep.subr.bf16.mxu1 %v4649_v57  ;;  %v1172_v62 = vpop.f32.mrb[2].mxu0  ;;  %v4722_v57 = vld [vmem:[#allocation8 + $0x2a0] ss:$16 sps:$4 sm:$0xff]  }
 0x15e   :  { %v1173_v63 = vpop.f32.mrb[3].mxu0  ;;  %v4731_v62 = vld [vmem:[#allocation8 + $0x2c8] ss:$16 sps:$4 sm:$0xff]  }
 0x15f   :  { %v4736_v63 = vld [vmem:[#allocation8 + $0x2e4] ss:$16 sps:$4 sm:$0xff]  }
 0x160   :  { %3176 = vmatpush1.bf16.msra.mxu1 %v4647_v59  ;;  %v4730_v59 = vld [vmem:[#allocation8 + $0x2c4] ss:$16 sps:$4 sm:$0xff]  }
 0x161   :  { %3177 = vmatprep.subr.bf16.mxu1 %v4655_v61  ;;  %v4728_v61 = vld [vmem:[#allocation8 + $0x2c0] ss:$16 sps:$4 sm:$0xff]  }
 0x164   :  { %3178 = vmatpush1.bf16.msra.mxu1 %v4653_v1  ;;  %v4739_v1 = vld [vmem:[#allocation8 + $0x2ec] ss:$16 sps:$4 sm:$0xff]  }
 0x165   :  { %3179 = vmatprep.subr.bf16.mxu1 %v4661_v2  ;;  %v4734_v2 = vld [vmem:[#allocation8 + $0x2e0] ss:$16 sps:$4 sm:$0xff]  }
 0x167   :  { %v5428_v5 = vpop.f32.mrb[4].mxu0 }
 0x168   :  { %3180 = vmatpush1.bf16.msra.mxu1 %v4659_v3  ;;  %v5430_v7 = vpop.f32.mrb[5].mxu0  ;;  %v4737_v3 = vld [vmem:[#allocation8 + $0x2e8] ss:$16 sps:$4 sm:$0xff]  }
 0x169   :  { %3181 = vmatprep.subr.bf16.mxu1 %v4667_v4  ;;  %v1254_v9 = vpop.f32.mrb[6].mxu0  ;;  %v4742_v4 = vld [vmem:[#allocation8 + $0x304] ss:$16 sps:$4 sm:$0xff]  }
 0x16a   :  { %v1255_v10 = vpop.f32.mrb[7].mxu0  ;;  %v4743_v9 = vld [vmem:[#allocation8 + $0x308] ss:$16 sps:$4 sm:$0xff]  }
 0x16b   :  { %v4748_v10 = vld [vmem:[#allocation8 + $0x324] ss:$16 sps:$4 sm:$0xff]  }
 0x16c   :  { %3182 = vmatpush1.bf16.msra.mxu1 %v4665_v6  ;;  %v4745_v6 = vld [vmem:[#allocation8 + $0x30c] ss:$16 sps:$4 sm:$0xff]  }
 0x16d   :  { %3183 = vmatprep.subr.bf16.mxu1 %v4673_v8  ;;  %v4740_v8 = vld [vmem:[#allocation8 + $0x300] ss:$16 sps:$4 sm:$0xff]  }
 0x170   :  { %3184 = vmatpush1.bf16.msra.mxu1 %v4671_v11  ;;  %v4751_v11 = vld [vmem:[#allocation8 + $0x32c] ss:$16 sps:$4 sm:$0xff]  }
 0x171   :  { %3185 = vmatprep.subr.bf16.mxu1 %v4679_v12  ;;  %v4746_v12 = vld [vmem:[#allocation8 + $0x320] ss:$16 sps:$4 sm:$0xff]  }
 0x174   :  { %3186 = vmatpush1.bf16.msra.mxu1 %v4677_v13  ;;  %v4749_v13 = vld [vmem:[#allocation8 + $0x328] ss:$16 sps:$4 sm:$0xff]  }
 0x175   :  { %3187 = vmatprep.subr.bf16.mxu1 %v4685_v15  ;;  %v4754_v15 = vld [vmem:[#allocation8 + $0x344] ss:$16 sps:$4 sm:$0xff]  }
 0x178   :  { %3188 = vmatpush1.bf16.msra.mxu1 %v4683_v16  ;;  %v4757_v16 = vld [vmem:[#allocation8 + $0x34c] ss:$16 sps:$4 sm:$0xff]  }
 0x179   :  { %3189 = vmatprep.subr.bf16.mxu1 %v4691_v17 }
 0x17c   :  { %3190 = vmatpush1.bf16.msra.mxu1 %v4689_v19 }
 0x17d   :  { %3200 = vmatprep.subr.bf16.mxu1 %v4697_v20  ;;  %v4752_v20 = vld [vmem:[#allocation8 + $0x340] ss:$16 sps:$4 sm:$0xff]  }
 0x186   :  { %v1127_v27 = vpop.f32.mrb[0].mxu1 }
 0x187   :  { %v1128_v28 = vadd.f32 %v1127_v27, %v275_v25  ;;  %v1129_v29 = vpop.f32.mrb[1].mxu1  ;;  %v4755_v25 = vld [vmem:[#allocation8 + $0x348] ss:$16 sps:$4 sm:$0xff]   ;;  %v4760_v27 = vld [vmem:[#allocation8 + $0x364] ss:$16 sps:$4 sm:$0xff]  }
 0x188   :  { %v1130_v30 = vadd.f32 %v1129_v29, %v279_v26  ;;  %v1131_v35 = vpop.f32.mrb[2].mxu1  ;;  %v4758_v29 = vld [vmem:[#allocation8 + $0x360] ss:$16 sps:$4 sm:$0xff]  }
 0x189   :  { %v1169_v31 = vadd.f32 %v1168_v58, %v1128_v28  ;;  %v1132_v32 = vpop.f32.mrb[3].mxu1  ;;  %v4725_v58 = vld [vmem:[#allocation8 + $0x2a8] ss:$16 sps:$4 sm:$0xff]   ;;  %v4763_v28 = vld [vmem:[#allocation8 + $0x36c] ss:$16 sps:$4 sm:$0xff]  }
 0x18a   :  { %v1171_v33 = vadd.f32 %v1170_v60, %v1130_v30  ;;  %v4733_v60 = vld [vmem:[#allocation8 + $0x2cc] ss:$16 sps:$4 sm:$0xff]   ;;  %v4761_v30 = vld [vmem:[#allocation8 + $0x368] ss:$16 sps:$4 sm:$0xff]   ;;  %v4766_v35 = vld [vmem:[#allocation8 + $0x384] ss:$16 sps:$4 sm:$0xff]  }
 0x18b   :  { %v1421_v34 = vmax.f32 %v1169_v31, 0.0  ;;  %v4769_v31 = vld [vmem:[#allocation8 + $0x38c] ss:$16 sps:$4 sm:$0xff]   ;;  %v4764_v32 = vld [vmem:[#allocation8 + $0x380] ss:$16 sps:$4 sm:$0xff]  }
 0x18c   :  { %v1422_v36 = vmax.f32 %v1171_v33, 0.0  ;;  %v4767_v33 = vld [vmem:[#allocation8 + $0x388] ss:$16 sps:$4 sm:$0xff]  }
 0x18d   :  { %v1429_v40 = vpack.c.bf16 %v1421_v34, %v1421_v34  ;;  %v4772_v34 = vld [vmem:[#allocation8 + $0x3a4] ss:$16 sps:$4 sm:$0xff]  }
 0x18e   :  { %v1430_v37 = vpack.c.bf16 %v1422_v36, %v1422_v36  ;;  %v4775_v36 = vld [vmem:[#allocation8 + $0x3ac] ss:$16 sps:$4 sm:$0xff]  }
 0x190   :  { %3027 = vmatprep.mubr.bf16.mxu0 %v1430_v37  ;;  %3191 = vmatprep.mubr.bf16.mxu1 %v1430_v37  ;;  %v282_v37 = vsub.s32 2, %v5432_v21 }
 0x191   :  { %3028 = vmatmul.mubr.bf16.vlgmr.msra.gmra.mrb[12].mxu0 %v1429_v40  ;;  %3192 = vmatmul.mubr.bf16.vlgmr.msra.gmra.mrb[12].mxu1 %v1429_v40  ;;  %v4770_v40 = vld [vmem:[#allocation8 + $0x3a0] ss:$16 sps:$4 sm:$0xff]  }
 0x192   :  { %3037 = vmatpush1.bf16.msra.mxu0 %v4692_v38  ;;  %3201 = vmatpush1.bf16.msra.mxu1 %v4695_v39  ;;  %v286_v38 = vsub.s32 3, %v5432_v21  ;;  %v294_v39 = vsub.s32 5, %v5432_v21 }
 0x193   :  { %3038 = vmatprep.subr.bf16.mxu0 %v4700_v41  ;;  %3202 = vmatprep.subr.bf16.mxu1 %v4703_v42  ;;  %v4773_v41 = vld [vmem:[#allocation8 + $0x3a8] ss:$16 sps:$4 sm:$0xff]   ;;  %v283_v42 = vrot.slane %v5437_v23, %v282_v37 }
 0x196   :  { %3039 = vmatpush1.bf16.msra.mxu0 %v4698_v43  ;;  %3203 = vmatpush1.bf16.msra.mxu1 %v4701_v44  ;;  %v4778_v43 = vld [vmem:[#allocation8 + $0x3c4] ss:$16 sps:$4 sm:$0xff]   ;;  %v4781_v44 = vld [vmem:[#allocation8 + $0x3cc] ss:$16 sps:$4 sm:$0xff]  }
 0x197   :  { %3040 = vmatprep.subr.bf16.mxu0 %v4706_v45  ;;  %3204 = vmatprep.subr.bf16.mxu1 %v4709_v14  ;;  %v287_v45 = vrot.slane %v5437_v23, %v286_v38  ;;  %v295_v14 = vrot.slane %v5437_v23, %v294_v39  ;;  %v4832_v39 = vld [vmem:[#allocation8 + $0x4e4] ss:$16 sps:$4 sm:$0xff]  }
 0x19a   :  { %3041 = vmatpush1.bf16.msra.mxu0 %v4704_v46  ;;  %3205 = vmatpush1.bf16.msra.mxu1 %v4707_v0  ;;  %v4776_v0 = vld [vmem:[#allocation8 + $0x3c0] ss:$16 sps:$4 sm:$0xff]  }
 0x19b   :  { %3042 = vmatprep.subr.bf16.mxu0 %v4712_v48  ;;  %3206 = vmatprep.subr.bf16.mxu1 %v4715_v49  ;;  %v4779_v48 = vld [vmem:[#allocation8 + $0x3c8] ss:$16 sps:$4 sm:$0xff]  }
 0x19e   :  { %3043 = vmatpush1.bf16.msra.mxu0 %v4710_v50  ;;  %3207 = vmatpush1.bf16.msra.mxu1 %v4713_v51  ;;  %v4784_v51 = vld [vmem:[#allocation8 + $0x3e4] ss:$16 sps:$4 sm:$0xff]  }
 0x19f   :  { %3044 = vmatprep.subr.bf16.mxu0 %v4718_v52  ;;  %3208 = vmatprep.subr.bf16.mxu1 %v4721_v53  ;;  %v4787_v52 = vld [vmem:[#allocation8 + $0x3ec] ss:$16 sps:$4 sm:$0xff]  }
 0x1a2   :  { %3045 = vmatpush1.bf16.msra.mxu0 %v4716_v47  ;;  %3209 = vmatpush1.bf16.msra.mxu1 %v4719_v54 }
 0x1a3   :  { %3046 = vmatprep.subr.bf16.mxu0 %v4724_v55  ;;  %3210 = vmatprep.subr.bf16.mxu1 %v4727_v56 }
 0x1a6   :  { %3047 = vmatpush1.bf16.msra.mxu0 %v4722_v57  ;;  %3211 = vmatpush1.bf16.msra.mxu1 %v4725_v58  ;;  %v4782_v58 = vld [vmem:[#allocation8 + $0x3e0] ss:$16 sps:$4 sm:$0xff]  }
 0x1a7   :  { %3048 = vmatprep.subr.bf16.mxu0 %v4730_v59  ;;  %3212 = vmatprep.subr.bf16.mxu1 %v4733_v60  ;;  %v4785_v59 = vld [vmem:[#allocation8 + $0x3e8] ss:$16 sps:$4 sm:$0xff]  }
 0x1aa   :  { %3049 = vmatpush1.bf16.msra.mxu0 %v4728_v61  ;;  %3213 = vmatpush1.bf16.msra.mxu1 %v4731_v62  ;;  %v4790_v61 = vld [vmem:[#allocation8 + $0x404] ss:$16 sps:$4 sm:$0xff]   ;;  %v4793_v62 = vld [vmem:[#allocation8 + $0x40c] ss:$16 sps:$4 sm:$0xff]  }
 0x1ab   :  { %3050 = vmatprep.subr.bf16.mxu0 %v4736_v63  ;;  %3214 = vmatprep.subr.bf16.mxu1 %v4739_v1 }
 0x1ae   :  { %3051 = vmatpush1.bf16.msra.mxu0 %v4734_v2  ;;  %3215 = vmatpush1.bf16.msra.mxu1 %v4737_v3  ;;  %v4788_v3 = vld [vmem:[#allocation8 + $0x400] ss:$16 sps:$4 sm:$0xff]  }
 0x1af   :  { %3052 = vmatprep.subr.bf16.mxu0 %v4742_v4  ;;  %3216 = vmatprep.subr.bf16.mxu1 %v4745_v6  ;;  %v4791_v4 = vld [vmem:[#allocation8 + $0x408] ss:$16 sps:$4 sm:$0xff]   ;;  %v4799_v6 = vld [vmem:[#allocation8 + $0x42c] ss:$16 sps:$4 sm:$0xff]  }
 0x1b2   :  { %3053 = vmatpush1.bf16.msra.mxu0 %v4740_v8  ;;  %3217 = vmatpush1.bf16.msra.mxu1 %v4743_v9  ;;  %v4794_v9 = vld [vmem:[#allocation8 + $0x420] ss:$16 sps:$4 sm:$0xff]  }
 0x1b3   :  { %3054 = vmatprep.subr.bf16.mxu0 %v4748_v10  ;;  %3218 = vmatprep.subr.bf16.mxu1 %v4751_v11  ;;  %v5446_v17 = vpop.f32.mrb[8].mxu0  ;;  %v4797_v10 = vld [vmem:[#allocation8 + $0x428] ss:$16 sps:$4 sm:$0xff]   ;;  %v4802_v11 = vld [vmem:[#allocation8 + $0x444] ss:$16 sps:$4 sm:$0xff]  }
 0x1b4   :  { %v1334_v18 = vpop.f32.mrb[9].mxu0 }
 0x1b5   :  { %v1336_v19 = vpop.f32.mrb[10].mxu0  ;;  %v4535_v54 = vadd.f32 %v1334_v18, %v295_v14  ;;  %v4811_v18 = vld [vmem:[#allocation8 + $0x46c] ss:$16 sps:$4 sm:$0xff]   ;;  %v4839_v14 = vld [vmem:[#allocation8 + $0x508] ss:$16 sps:$4 sm:$0xff]  }
 0x1b6   :  { %3055 = vmatpush1.bf16.msra.mxu0 %v4746_v12  ;;  %3219 = vmatpush1.bf16.msra.mxu1 %v4749_v13  ;;  %v1337_v26 = vpop.f32.mrb[11].mxu0  ;;  %v4805_v12 = vld [vmem:[#allocation8 + $0x44c] ss:$16 sps:$4 sm:$0xff]   ;;  %v4800_v13 = vld [vmem:[#allocation8 + $0x440] ss:$16 sps:$4 sm:$0xff]  }
 0x1b7   :  { %3056 = vmatprep.subr.bf16.mxu0 %v4754_v15  ;;  %3220 = vmatprep.subr.bf16.mxu1 %v4757_v16  ;;  %v1426_v1 = vmax.f32 %v4535_v54, 0.0  ;;  %v4803_v15 = vld [vmem:[#allocation8 + $0x448] ss:$16 sps:$4 sm:$0xff]   ;;  %v4808_v16 = vld [vmem:[#allocation8 + $0x464] ss:$16 sps:$4 sm:$0xff]  }
 0x1b8   :  { %v4806_v19 = vld [vmem:[#allocation8 + $0x460] ss:$16 sps:$4 sm:$0xff]   ;;  %v4817_v26 = vld [vmem:[#allocation8 + $0x48c] ss:$16 sps:$4 sm:$0xff]  }
 0x1b9   :  { %v1434_v8 = vpack.c.bf16 %v1426_v1, %v1426_v1  ;;  %v4859_v54 = vld [vmem:[#allocation8 + $0x56c] ss:$16 sps:$4 sm:$0xff]   ;;  %v4866_v1 = vld [vmem:[#allocation8 + $0x5a0] ss:$16 sps:$4 sm:$0xff]  }
 0x1ba   :  { %3057 = vmatpush1.bf16.msra.mxu0 %v4752_v20  ;;  %3221 = vmatpush1.bf16.msra.mxu1 %v4755_v25  ;;  %v4809_v20 = vld [vmem:[#allocation8 + $0x468] ss:$16 sps:$4 sm:$0xff]   ;;  %v4814_v25 = vld [vmem:[#allocation8 + $0x484] ss:$16 sps:$4 sm:$0xff]  }
 0x1bb   :  { %3058 = vmatprep.subr.bf16.mxu0 %v4760_v27  ;;  %3222 = vmatprep.subr.bf16.mxu1 %v4763_v28  ;;  %v4812_v27 = vld [vmem:[#allocation8 + $0x480] ss:$16 sps:$4 sm:$0xff]   ;;  %v4815_v28 = vld [vmem:[#allocation8 + $0x488] ss:$16 sps:$4 sm:$0xff]  }
 0x1be   :  { %3059 = vmatpush1.bf16.msra.mxu0 %v4758_v29  ;;  %3223 = vmatpush1.bf16.msra.mxu1 %v4761_v30  ;;  %v4820_v29 = vld [vmem:[#allocation8 + $0x4a4] ss:$16 sps:$4 sm:$0xff]   ;;  %v4823_v30 = vld [vmem:[#allocation8 + $0x4ac] ss:$16 sps:$4 sm:$0xff]  }
 0x1bf   :  { %3060 = vmatprep.subr.bf16.mxu0 %v4766_v35  ;;  %3224 = vmatprep.subr.bf16.mxu1 %v4769_v31  ;;  %v4818_v35 = vld [vmem:[#allocation8 + $0x4a0] ss:$16 sps:$4 sm:$0xff]   ;;  %v4821_v31 = vld [vmem:[#allocation8 + $0x4a8] ss:$16 sps:$4 sm:$0xff]  }
 0x1c2   :  { %3061 = vmatpush1.bf16.msra.mxu0 %v4764_v32  ;;  %3225 = vmatpush1.bf16.msra.mxu1 %v4767_v33  ;;  %v4826_v32 = vld [vmem:[#allocation8 + $0x4c4] ss:$16 sps:$4 sm:$0xff]   ;;  %v4829_v33 = vld [vmem:[#allocation8 + $0x4cc] ss:$16 sps:$4 sm:$0xff]  }
 0x1c3   :  { %3062 = vmatprep.subr.bf16.mxu0 %v4772_v34  ;;  %3226 = vmatprep.subr.bf16.mxu1 %v4775_v36  ;;  %v4824_v34 = vld [vmem:[#allocation8 + $0x4c0] ss:$16 sps:$4 sm:$0xff]   ;;  %v4827_v36 = vld [vmem:[#allocation8 + $0x4c8] ss:$16 sps:$4 sm:$0xff]  }
 0x1c6   :  { %3063 = vmatpush1.bf16.msra.mxu0 %v4770_v40  ;;  %3227 = vmatpush1.bf16.msra.mxu1 %v4773_v41  ;;  %v1209_v46 = vpop.f32.mrb[4].mxu1  ;;  %v4835_v40 = vld [vmem:[#allocation8 + $0x4ec] ss:$16 sps:$4 sm:$0xff]   ;;  %v4830_v41 = vld [vmem:[#allocation8 + $0x4e0] ss:$16 sps:$4 sm:$0xff]  }
 0x1c7   :  { %v1210_v49 = vadd.f32 %v1209_v46, %v283_v42  ;;  %v1211_v50 = vpop.f32.mrb[5].mxu1  ;;  %3064 = vmatprep.subr.bf16.mxu0 %v4778_v43  ;;  %3228 = vmatprep.subr.bf16.mxu1 %v4781_v44  ;;  %v4833_v42 = vld [vmem:[#allocation8 + $0x4e8] ss:$16 sps:$4 sm:$0xff]   ;;  %v4838_v43 = vld [vmem:[#allocation8 + $0x504] ss:$16 sps:$4 sm:$0xff]  }
 0x1c8   :  { %v1212_v53 = vadd.f32 %v1211_v50, %v287_v45  ;;  %v1213_v47 = vpop.f32.mrb[6].mxu1  ;;  %v4841_v44 = vld [vmem:[#allocation8 + $0x50c] ss:$16 sps:$4 sm:$0xff]   ;;  %v4836_v45 = vld [vmem:[#allocation8 + $0x500] ss:$16 sps:$4 sm:$0xff]  }
 0x1c9   :  { %v1251_v55 = vadd.f32 %v5428_v5, %v1210_v49  ;;  %v1214_v56 = vpop.f32.mrb[7].mxu1  ;;  %v4844_v46 = vld [vmem:[#allocation8 + $0x524] ss:$16 sps:$4 sm:$0xff]   ;;  %v4845_v49 = vld [vmem:[#allocation8 + $0x528] ss:$16 sps:$4 sm:$0xff]  }
 0x1ca   :  { %v1253_v57 = vadd.f32 %v5430_v7, %v1212_v53  ;;  %3065 = vmatpush1.bf16.msra.mxu0 %v4776_v0  ;;  %3229 = vmatpush1.bf16.msra.mxu1 %v4779_v48  ;;  %v4796_v7 = vld [vmem:[#allocation8 + $0x424] ss:$16 sps:$4 sm:$0xff]   ;;  %v4847_v0 = vld [vmem:[#allocation8 + $0x52c] ss:$16 sps:$4 sm:$0xff]   ;;  %v4842_v48 = vld [vmem:[#allocation8 + $0x520] ss:$16 sps:$4 sm:$0xff]  }
 0x1cb   :  { %v1423_v60 = vmax.f32 %v1251_v55, 0.0  ;;  %3066 = vmatprep.subr.bf16.mxu0 %v4784_v51  ;;  %3230 = vmatprep.subr.bf16.mxu1 %v4787_v52  ;;  %v4850_v50 = vld [vmem:[#allocation8 + $0x544] ss:$16 sps:$4 sm:$0xff]   ;;  %v4853_v51 = vld [vmem:[#allocation8 + $0x54c] ss:$16 sps:$4 sm:$0xff]  }
 0x1cc   :  { %v1424_v63 = vmax.f32 %v1253_v57, 0.0  ;;  %v4848_v52 = vld [vmem:[#allocation8 + $0x540] ss:$16 sps:$4 sm:$0xff]   ;;  %v4851_v53 = vld [vmem:[#allocation8 + $0x548] ss:$16 sps:$4 sm:$0xff]  }
 0x1cd   :  { %v1431_v5 = vpack.c.bf16 %v1423_v60, %v1423_v60  ;;  %v4856_v47 = vld [vmem:[#allocation8 + $0x564] ss:$16 sps:$4 sm:$0xff]   ;;  %v4854_v55 = vld [vmem:[#allocation8 + $0x560] ss:$16 sps:$4 sm:$0xff]   ;;  %v4857_v56 = vld [vmem:[#allocation8 + $0x568] ss:$16 sps:$4 sm:$0xff]  }
 0x1ce   :  { %v1432_v2 = vpack.c.bf16 %v1424_v63, %v1424_v63  ;;  %3067 = vmatpush1.bf16.msra.mxu0 %v4782_v58  ;;  %3231 = vmatpush1.bf16.msra.mxu1 %v4785_v59  ;;  %v4862_v57 = vld [vmem:[#allocation8 + $0x584] ss:$16 sps:$4 sm:$0xff]   ;;  %v4865_v58 = vld [vmem:[#allocation8 + $0x58c] ss:$16 sps:$4 sm:$0xff]   ;;  %v4860_v59 = vld [vmem:[#allocation8 + $0x580] ss:$16 sps:$4 sm:$0xff]  }
 0x1cf   :  { %3077 = vmatprep.subr.bf16.mxu0 %v4790_v61  ;;  %3241 = vmatprep.subr.bf16.mxu1 %v4793_v62  ;;  %v4863_v60 = vld [vmem:[#allocation8 + $0x588] ss:$16 sps:$4 sm:$0xff]   ;;  %v290_v61 = vsub.s32 4, %v5432_v21  ;;  %v4868_v62 = vld [vmem:[#allocation8 + $0x5a4] ss:$16 sps:$4 sm:$0xff]  }
 0x1d0   :  { %3068 = vmatprep.mubr.bf16.mxu0 %v1432_v2  ;;  %3232 = vmatprep.mubr.bf16.mxu1 %v1432_v2  ;;  %v4871_v63 = vld [vmem:[#allocation8 + $0x5ac] ss:$16 sps:$4 sm:$0xff]   ;;  %v4869_v2 = vld [vmem:[#allocation8 + $0x5a8] ss:$16 sps:$4 sm:$0xff]  }
 0x1d1   :  { %3069 = vmatmul.mubr.bf16.vlgmr.msra.gmra.mrb[12].mxu0 %v1431_v5  ;;  %3233 = vmatmul.mubr.bf16.vlgmr.msra.gmra.mrb[12].mxu1 %v1431_v5  ;;  %v4877_v5 = vld [vmem:[#allocation8 + $0x5cc] ss:$16 sps:$4 sm:$0xff]  }
 0x1d2   :  { %3078 = vmatpush1.bf16.msra.mxu0 %v4788_v3  ;;  %3242 = vmatpush1.bf16.msra.mxu1 %v4791_v4  ;;  %v291_v3 = vrot.slane %v5437_v23, %v290_v61  ;;  %v4874_v4 = vld [vmem:[#allocation8 + $0x5c4] ss:$16 sps:$4 sm:$0xff]  }
 0x1d3   :  { %3079 = vmatprep.subr.bf16.mxu0 %v4796_v7  ;;  %3243 = vmatprep.subr.bf16.mxu1 %v4799_v6  ;;  %v4872_v7 = vld [vmem:[#allocation8 + $0x5c0] ss:$16 sps:$4 sm:$0xff]   ;;  %v4875_v6 = vld [vmem:[#allocation8 + $0x5c8] ss:$16 sps:$4 sm:$0xff]   ;;  %v4934_v61 = vld [vmem:[#allocation8 + $0x704] ss:$16 sps:$4 sm:$0xff]  }
 0x1d4   :  { %3109 = vmatprep.mubr.bf16.mxu0 %v1434_v8  ;;  %3273 = vmatprep.mubr.bf16.mxu1 %v1434_v8  ;;  %v4534_v8 = vadd.f32 %v5446_v17, %v291_v3  ;;  %v4943_v3 = vld [vmem:[#allocation8 + $0x72c] ss:$16 sps:$4 sm:$0xff]  }
 0x1d6   :  { %3080 = vmatpush1.bf16.msra.mxu0 %v4794_v9  ;;  %3244 = vmatpush1.bf16.msra.mxu1 %v4797_v10  ;;  %v4880_v9 = vld [vmem:[#allocation8 + $0x5e4] ss:$16 sps:$4 sm:$0xff]   ;;  %v4883_v10 = vld [vmem:[#allocation8 + $0x5ec] ss:$16 sps:$4 sm:$0xff]  }
 0x1d7   :  { %3081 = vmatprep.subr.bf16.mxu0 %v4802_v11  ;;  %3245 = vmatprep.subr.bf16.mxu1 %v4805_v12  ;;  %v4878_v11 = vld [vmem:[#allocation8 + $0x5e0] ss:$16 sps:$4 sm:$0xff]   ;;  %v4881_v12 = vld [vmem:[#allocation8 + $0x5e8] ss:$16 sps:$4 sm:$0xff]  }
 0x1da   :  { %3082 = vmatpush1.bf16.msra.mxu0 %v4800_v13  ;;  %3246 = vmatpush1.bf16.msra.mxu1 %v4803_v15  ;;  %v1425_v13 = vmax.f32 %v4534_v8, 0.0  ;;  %v4886_v15 = vld [vmem:[#allocation8 + $0x604] ss:$16 sps:$4 sm:$0xff]   ;;  %v4944_v8 = vld [vmem:[#allocation8 + $0x740] ss:$16 sps:$4 sm:$0xff]  }
 0x1db   :  { %3083 = vmatprep.subr.bf16.mxu0 %v4808_v16  ;;  %3247 = vmatprep.subr.bf16.mxu1 %v4811_v18  ;;  %v4889_v16 = vld [vmem:[#allocation8 + $0x60c] ss:$16 sps:$4 sm:$0xff]   ;;  %v302_v18 = vsub.s32 7, %v5432_v21 }
 0x1dc   :  { %v1433_v17 = vpack.c.bf16 %v1425_v13, %v1425_v13  ;;  %v4953_v13 = vld [vmem:[#allocation8 + $0x768] ss:$16 sps:$4 sm:$0xff]  }
 0x1de   :  { %3084 = vmatpush1.bf16.msra.mxu0 %v4806_v19  ;;  %3248 = vmatpush1.bf16.msra.mxu1 %v4809_v20  ;;  %v4884_v19 = vld [vmem:[#allocation8 + $0x600] ss:$16 sps:$4 sm:$0xff]   ;;  %v4887_v20 = vld [vmem:[#allocation8 + $0x608] ss:$16 sps:$4 sm:$0xff]  }
 0x1df   :  { %3085 = vmatprep.subr.bf16.mxu0 %v4814_v25  ;;  %3249 = vmatprep.subr.bf16.mxu1 %v4817_v26  ;;  %v4892_v25 = vld [vmem:[#allocation8 + $0x624] ss:$16 sps:$4 sm:$0xff]   ;;  %v4895_v26 = vld [vmem:[#allocation8 + $0x62c] ss:$16 sps:$4 sm:$0xff]  }
 0x1e2   :  { %3086 = vmatpush1.bf16.msra.mxu0 %v4812_v27  ;;  %3250 = vmatpush1.bf16.msra.mxu1 %v4815_v28  ;;  %v303_v27 = vrot.slane %v5437_v23, %v302_v18  ;;  %v4890_v28 = vld [vmem:[#allocation8 + $0x620] ss:$16 sps:$4 sm:$0xff]  }
 0x1e3   :  { %3087 = vmatprep.subr.bf16.mxu0 %v4820_v29  ;;  %3251 = vmatprep.subr.bf16.mxu1 %v4823_v30  ;;  %v4893_v29 = vld [vmem:[#allocation8 + $0x628] ss:$16 sps:$4 sm:$0xff]   ;;  %v4956_v18 = vld [vmem:[#allocation8 + $0x780] ss:$16 sps:$4 sm:$0xff]  }
 0x1e6   :  { %3088 = vmatpush1.bf16.msra.mxu0 %v4818_v35  ;;  %3252 = vmatpush1.bf16.msra.mxu1 %v4821_v31  ;;  %v4898_v35 = vld [vmem:[#allocation8 + $0x644] ss:$16 sps:$4 sm:$0xff]   ;;  %v4901_v31 = vld [vmem:[#allocation8 + $0x64c] ss:$16 sps:$4 sm:$0xff]  }
 0x1e7   :  { %3089 = vmatprep.subr.bf16.mxu0 %v4826_v32  ;;  %3253 = vmatprep.subr.bf16.mxu1 %v4829_v33 }
 0x1ea   :  { %3090 = vmatpush1.bf16.msra.mxu0 %v4824_v34  ;;  %3254 = vmatpush1.bf16.msra.mxu1 %v4827_v36 }
 0x1eb   :  { %3091 = vmatprep.subr.bf16.mxu0 %v4832_v39  ;;  %3255 = vmatprep.subr.bf16.mxu1 %v4835_v40  ;;  %v4896_v39 = vld [vmem:[#allocation8 + $0x640] ss:$16 sps:$4 sm:$0xff]   ;;  %v4899_v40 = vld [vmem:[#allocation8 + $0x648] ss:$16 sps:$4 sm:$0xff]  }
 0x1ee   :  { %3092 = vmatpush1.bf16.msra.mxu0 %v4830_v41  ;;  %3256 = vmatpush1.bf16.msra.mxu1 %v4833_v42  ;;  %v4904_v42 = vld [vmem:[#allocation8 + $0x664] ss:$16 sps:$4 sm:$0xff]  }
 0x1ef   :  { %3093 = vmatprep.subr.bf16.mxu0 %v4838_v43  ;;  %3257 = vmatprep.subr.bf16.mxu1 %v4841_v44  ;;  %v4907_v43 = vld [vmem:[#allocation8 + $0x66c] ss:$16 sps:$4 sm:$0xff]  }
 0x1f2   :  { %3094 = vmatpush1.bf16.msra.mxu0 %v4836_v45  ;;  %3258 = vmatpush1.bf16.msra.mxu1 %v4839_v14  ;;  %v4902_v45 = vld [vmem:[#allocation8 + $0x660] ss:$16 sps:$4 sm:$0xff]   ;;  %v4905_v14 = vld [vmem:[#allocation8 + $0x668] ss:$16 sps:$4 sm:$0xff]  }
 0x1f3   :  { %3095 = vmatprep.subr.bf16.mxu0 %v4844_v46  ;;  %3259 = vmatprep.subr.bf16.mxu1 %v4847_v0  ;;  %v4910_v46 = vld [vmem:[#allocation8 + $0x684] ss:$16 sps:$4 sm:$0xff]   ;;  %v4913_v0 = vld [vmem:[#allocation8 + $0x68c] ss:$16 sps:$4 sm:$0xff]  }
 0x1f6   :  { %3096 = vmatpush1.bf16.msra.mxu0 %v4842_v48  ;;  %3260 = vmatpush1.bf16.msra.mxu1 %v4845_v49  ;;  %v4908_v48 = vld [vmem:[#allocation8 + $0x680] ss:$16 sps:$4 sm:$0xff]   ;;  %v4911_v49 = vld [vmem:[#allocation8 + $0x688] ss:$16 sps:$4 sm:$0xff]  }
 0x1f7   :  { %3097 = vmatprep.subr.bf16.mxu0 %v4850_v50  ;;  %3261 = vmatprep.subr.bf16.mxu1 %v4853_v51  ;;  %v4916_v50 = vld [vmem:[#allocation8 + $0x6a4] ss:$16 sps:$4 sm:$0xff]   ;;  %v4919_v51 = vld [vmem:[#allocation8 + $0x6ac] ss:$16 sps:$4 sm:$0xff]  }
 0x1fa   :  { %3098 = vmatpush1.bf16.msra.mxu0 %v4848_v52  ;;  %3262 = vmatpush1.bf16.msra.mxu1 %v4851_v53  ;;  %v4914_v52 = vld [vmem:[#allocation8 + $0x6a0] ss:$16 sps:$4 sm:$0xff]   ;;  %v4917_v53 = vld [vmem:[#allocation8 + $0x6a8] ss:$16 sps:$4 sm:$0xff]  }
 0x1fb   :  { %3099 = vmatprep.subr.bf16.mxu0 %v4856_v47  ;;  %3263 = vmatprep.subr.bf16.mxu1 %v4859_v54  ;;  %v4922_v47 = vld [vmem:[#allocation8 + $0x6c4] ss:$16 sps:$4 sm:$0xff]   ;;  %v4925_v54 = vld [vmem:[#allocation8 + $0x6cc] ss:$16 sps:$4 sm:$0xff]  }
 0x1fe   :  { %3100 = vmatpush1.bf16.msra.mxu0 %v4854_v55  ;;  %3264 = vmatpush1.bf16.msra.mxu1 %v4857_v56  ;;  %v4920_v55 = vld [vmem:[#allocation8 + $0x6c0] ss:$16 sps:$4 sm:$0xff]   ;;  %v4923_v56 = vld [vmem:[#allocation8 + $0x6c8] ss:$16 sps:$4 sm:$0xff]  }
 0x1ff   :  { %3101 = vmatprep.subr.bf16.mxu0 %v4862_v57  ;;  %3265 = vmatprep.subr.bf16.mxu1 %v4865_v58  ;;  %v4928_v57 = vld [vmem:[#allocation8 + $0x6e4] ss:$16 sps:$4 sm:$0xff]   ;;  %v4931_v58 = vld [vmem:[#allocation8 + $0x6ec] ss:$16 sps:$4 sm:$0xff]  }
 0x202   :  { %3102 = vmatpush1.bf16.msra.mxu0 %v4860_v59  ;;  %3266 = vmatpush1.bf16.msra.mxu1 %v4863_v60  ;;  %v4926_v59 = vld [vmem:[#allocation8 + $0x6e0] ss:$16 sps:$4 sm:$0xff]   ;;  %v4929_v60 = vld [vmem:[#allocation8 + $0x6e8] ss:$16 sps:$4 sm:$0xff]  }
 0x203   :  { %3103 = vmatprep.subr.bf16.mxu0 %v4868_v62  ;;  %3267 = vmatprep.subr.bf16.mxu1 %v4871_v63  ;;  %v4937_v62 = vld [vmem:[#allocation8 + $0x70c] ss:$16 sps:$4 sm:$0xff]   ;;  %v4932_v63 = vld [vmem:[#allocation8 + $0x700] ss:$16 sps:$4 sm:$0xff]  }
 0x206   :  { %3104 = vmatpush1.bf16.msra.mxu0 %v4866_v1  ;;  %3268 = vmatpush1.bf16.msra.mxu1 %v4869_v2  ;;  %v4935_v1 = vld [vmem:[#allocation8 + $0x708] ss:$16 sps:$4 sm:$0xff]   ;;  %v4940_v2 = vld [vmem:[#allocation8 + $0x724] ss:$16 sps:$4 sm:$0xff]  }
 0x207   :  { %3105 = vmatprep.subr.bf16.mxu0 %v4874_v4  ;;  %3269 = vmatprep.subr.bf16.mxu1 %v4877_v5  ;;  %v4938_v4 = vld [vmem:[#allocation8 + $0x720] ss:$16 sps:$4 sm:$0xff]   ;;  %v4941_v5 = vld [vmem:[#allocation8 + $0x728] ss:$16 sps:$4 sm:$0xff]  }
 0x20a   :  { %3106 = vmatpush1.bf16.msra.mxu0 %v4872_v7  ;;  %3270 = vmatpush1.bf16.msra.mxu1 %v4875_v6  ;;  %v4946_v7 = vld [vmem:[#allocation8 + $0x744] ss:$16 sps:$4 sm:$0xff]   ;;  %v4949_v6 = vld [vmem:[#allocation8 + $0x74c] ss:$16 sps:$4 sm:$0xff]  }
 0x20b   :  { %3107 = vmatprep.subr.bf16.mxu0 %v4880_v9  ;;  %3271 = vmatprep.subr.bf16.mxu1 %v4883_v10  ;;  %v4947_v9 = vld [vmem:[#allocation8 + $0x748] ss:$16 sps:$4 sm:$0xff]   ;;  %v4952_v10 = vld [vmem:[#allocation8 + $0x764] ss:$16 sps:$4 sm:$0xff]  }
 0x20e   :  { %3108 = vmatpush1.bf16.msra.mxu0 %v4878_v11  ;;  %3272 = vmatpush1.bf16.msra.mxu1 %v4881_v12  ;;  %v4955_v11 = vld [vmem:[#allocation8 + $0x76c] ss:$16 sps:$4 sm:$0xff]   ;;  %v4950_v12 = vld [vmem:[#allocation8 + $0x760] ss:$16 sps:$4 sm:$0xff]  }
 0x20f   :  { %3118 = vmatprep.subr.bf16.mxu0 %v4886_v15  ;;  %3282 = vmatprep.subr.bf16.mxu1 %v4889_v16  ;;  %v4958_v15 = vld [vmem:[#allocation8 + $0x784] ss:$16 sps:$4 sm:$0xff]   ;;  %v4961_v16 = vld [vmem:[#allocation8 + $0x78c] ss:$16 sps:$4 sm:$0xff]  }
 0x211   :  { %3110 = vmatmul.mubr.bf16.vlgmr.msra.gmra.mrb[12].mxu0 %v1433_v17  ;;  %3274 = vmatmul.mubr.bf16.vlgmr.msra.gmra.mrb[12].mxu1 %v1433_v17  ;;  %v4964_v17 = vld [vmem:[#allocation8 + $0x7a4] ss:$16 sps:$4 sm:$0xff]  }
 0x212   :  { %3119 = vmatpush1.bf16.msra.mxu0 %v4884_v19  ;;  %3283 = vmatpush1.bf16.msra.mxu1 %v4887_v20  ;;  %v5465_v30 = vpop.f32.mrb[8].mxu1  ;;  %v4959_v19 = vld [vmem:[#allocation8 + $0x788] ss:$16 sps:$4 sm:$0xff]   ;;  %v298_v20 = vsub.s32 6, %v5432_v21 }
 0x213   :  { %3120 = vmatprep.subr.bf16.mxu0 %v4892_v25  ;;  %3284 = vmatprep.subr.bf16.mxu1 %v4895_v26  ;;  %v1416_v32 = vpop.f32.mrb[9].mxu1  ;;  %v4967_v25 = vld [vmem:[#allocation8 + $0x7ac] ss:$16 sps:$4 sm:$0xff]   ;;  %v4962_v26 = vld [vmem:[#allocation8 + $0x7a0] ss:$16 sps:$4 sm:$0xff]  }
 0x214   :  { %v4537_v33 = vadd.f32 %v1416_v32, %v303_v27  ;;  %v1418_v34 = vpop.f32.mrb[10].mxu1  ;;  %v4965_v27 = vld [vmem:[#allocation8 + $0x7a8] ss:$16 sps:$4 sm:$0xff]  }
 0x215   :  { %v1419_v36 = vpop.f32.mrb[11].mxu1  ;;  %v4971_v32 = vld [vmem:[#allocation8 + $0x7c8] ss:$16 sps:$4 sm:$0xff]   ;;  %v4976_v34 = vld [vmem:[#allocation8 + $0x7e4] ss:$16 sps:$4 sm:$0xff]  }
 0x216   :  { %3121 = vmatpush1.bf16.msra.mxu0 %v4890_v28  ;;  %3285 = vmatpush1.bf16.msra.mxu1 %v4893_v29  ;;  %v1428_v41 = vmax.f32 %v4537_v33, 0.0  ;;  %v299_v28 = vrot.slane %v5437_v23, %v298_v20  ;;  %v4970_v29 = vld [vmem:[#allocation8 + $0x7c4] ss:$16 sps:$4 sm:$0xff]   ;;  %v4979_v36 = vld [vmem:[#allocation8 + $0x7ec] ss:$16 sps:$4 sm:$0xff]  }
 0x217   :  { %3122 = vmatprep.subr.bf16.mxu0 %v4898_v35  ;;  %3286 = vmatprep.subr.bf16.mxu1 %v4901_v31  ;;  %v4973_v35 = vld [vmem:[#allocation8 + $0x7cc] ss:$16 sps:$4 sm:$0xff]   ;;  %v4968_v31 = vld [vmem:[#allocation8 + $0x7c0] ss:$16 sps:$4 sm:$0xff]  }
 0x218   :  { %v1436_v44 = vpack.c.bf16 %v1428_v41, %v1428_v41  ;;  %v4536_v33 = vadd.f32 %v5465_v30, %v299_v28  ;;  %v4982_v23 = vld [vmem:[#allocation10 + $0x4] ss:$8 sps:$4 sm:$0xff]   ;;  %v4983_v30 = vld [vmem:[#allocation10 + $0x10] ss:$8 sps:$4 sm:$0xff]  }
 0x219   :  { %v5085_v20 = vld [vmem:[#allocation11 + $0x20] sm:$0xff]   ;;  %v5090_v21 = vld [vmem:[#allocation11 + $0x78] sm:$0xff]  }
 0x21a   :  { %3123 = vmatpush1.bf16.msra.mxu0 %v4896_v39  ;;  %3287 = vmatpush1.bf16.msra.mxu1 %v4899_v40  ;;  %v4974_v39 = vld [vmem:[#allocation8 + $0x7e0] ss:$16 sps:$4 sm:$0xff]   ;;  %v4977_v40 = vld [vmem:[#allocation8 + $0x7e8] ss:$16 sps:$4 sm:$0xff]   ;;  %v1427_v41 = vmax.f32 %v4536_v33, 0.0 }
 0x21b   :  { %3124 = vmatprep.subr.bf16.mxu0 %v4904_v42  ;;  %3288 = vmatprep.subr.bf16.mxu1 %v4907_v43  ;;  %v4980_v42 = vld [vmem:[#allocation10] ss:$8 sps:$4 sm:$0xff]  }
 0x21c   :  { %3150 = vmatprep.mubr.bf16.mxu0 %v1436_v44  ;;  %3314 = vmatprep.mubr.bf16.mxu1 %v1436_v44  ;;  %v1435_v43 = vpack.c.bf16 %v1427_v41, %v1427_v41  ;;  %v4985_v44 = vld [vmem:[#allocation10 + $0x14] ss:$8 sps:$4 sm:$0xff]  }
 0x21e   :  { %3125 = vmatpush1.bf16.msra.mxu0 %v4902_v45  ;;  %3289 = vmatpush1.bf16.msra.mxu1 %v4905_v14  ;;  %v4988_v45 = vld [vmem:[#allocation10 + $0x24] ss:$8 sps:$4 sm:$0xff]   ;;  %v4986_v14 = vld [vmem:[#allocation10 + $0x20] ss:$8 sps:$4 sm:$0xff]  }
 0x21f   :  { %3126 = vmatprep.subr.bf16.mxu0 %v4910_v46  ;;  %3290 = vmatprep.subr.bf16.mxu1 %v4913_v0  ;;  %v4991_v46 = vld [vmem:[#allocation10 + $0x34] ss:$8 sps:$4 sm:$0xff]   ;;  %v4989_v0 = vld [vmem:[#allocation10 + $0x30] ss:$8 sps:$4 sm:$0xff]  }
 0x222   :  { %3127 = vmatpush1.bf16.msra.mxu0 %v4908_v48  ;;  %3291 = vmatpush1.bf16.msra.mxu1 %v4911_v49  ;;  %v4994_v48 = vld [vmem:[#allocation10 + $0x44] ss:$8 sps:$4 sm:$0xff]   ;;  %v4992_v49 = vld [vmem:[#allocation10 + $0x40] ss:$8 sps:$4 sm:$0xff]  }
 0x223   :  { %3128 = vmatprep.subr.bf16.mxu0 %v4916_v50  ;;  %3292 = vmatprep.subr.bf16.mxu1 %v4919_v51  ;;  %v4997_v50 = vld [vmem:[#allocation10 + $0x54] ss:$8 sps:$4 sm:$0xff]   ;;  %v4995_v51 = vld [vmem:[#allocation10 + $0x50] ss:$8 sps:$4 sm:$0xff]  }
 0x226   :  { %3129 = vmatpush1.bf16.msra.mxu0 %v4914_v52  ;;  %3293 = vmatpush1.bf16.msra.mxu1 %v4917_v53  ;;  %v5000_v52 = vld [vmem:[#allocation10 + $0x64] ss:$8 sps:$4 sm:$0xff]   ;;  %v4998_v53 = vld [vmem:[#allocation10 + $0x60] ss:$8 sps:$4 sm:$0xff]  }
 0x227   :  { %3130 = vmatprep.subr.bf16.mxu0 %v4922_v47  ;;  %3294 = vmatprep.subr.bf16.mxu1 %v4925_v54  ;;  %v5003_v47 = vld [vmem:[#allocation10 + $0x74] ss:$8 sps:$4 sm:$0xff]   ;;  %v5001_v54 = vld [vmem:[#allocation10 + $0x70] ss:$8 sps:$4 sm:$0xff]  }
 0x22a   :  { %3131 = vmatpush1.bf16.msra.mxu0 %v4920_v55  ;;  %3295 = vmatpush1.bf16.msra.mxu1 %v4923_v56  ;;  %v5006_v55 = vld [vmem:[#allocation10 + $0x84] ss:$8 sps:$4 sm:$0xff]   ;;  %v5004_v56 = vld [vmem:[#allocation10 + $0x80] ss:$8 sps:$4 sm:$0xff]  }
 0x22b   :  { %3132 = vmatprep.subr.bf16.mxu0 %v4928_v57  ;;  %3296 = vmatprep.subr.bf16.mxu1 %v4931_v58  ;;  %v5009_v57 = vld [vmem:[#allocation10 + $0x94] ss:$8 sps:$4 sm:$0xff]   ;;  %v5007_v58 = vld [vmem:[#allocation10 + $0x90] ss:$8 sps:$4 sm:$0xff]  }
 0x22e   :  { %3133 = vmatpush1.bf16.msra.mxu0 %v4926_v59  ;;  %3297 = vmatpush1.bf16.msra.mxu1 %v4929_v60  ;;  %v5012_v59 = vld [vmem:[#allocation10 + $0xa4] ss:$8 sps:$4 sm:$0xff]   ;;  %v5010_v60 = vld [vmem:[#allocation10 + $0xa0] ss:$8 sps:$4 sm:$0xff]  }
 0x22f   :  { %3134 = vmatprep.subr.bf16.mxu0 %v4934_v61  ;;  %3298 = vmatprep.subr.bf16.mxu1 %v4937_v62  ;;  %v5015_v61 = vld [vmem:[#allocation10 + $0xb4] ss:$8 sps:$4 sm:$0xff]   ;;  %v5013_v62 = vld [vmem:[#allocation10 + $0xb0] ss:$8 sps:$4 sm:$0xff]  }
 0x232   :  { %3135 = vmatpush1.bf16.msra.mxu0 %v4932_v63  ;;  %3299 = vmatpush1.bf16.msra.mxu1 %v4935_v1  ;;  %v5018_v63 = vld [vmem:[#allocation10 + $0xc4] ss:$8 sps:$4 sm:$0xff]   ;;  %v5016_v1 = vld [vmem:[#allocation10 + $0xc0] ss:$8 sps:$4 sm:$0xff]  }
 0x233   :  { %3136 = vmatprep.subr.bf16.mxu0 %v4940_v2  ;;  %3300 = vmatprep.subr.bf16.mxu1 %v4943_v3  ;;  %v5021_v2 = vld [vmem:[#allocation10 + $0xd4] ss:$8 sps:$4 sm:$0xff]   ;;  %v5019_v3 = vld [vmem:[#allocation10 + $0xd0] ss:$8 sps:$4 sm:$0xff]  }
 0x236   :  { %3137 = vmatpush1.bf16.msra.mxu0 %v4938_v4  ;;  %3301 = vmatpush1.bf16.msra.mxu1 %v4941_v5  ;;  %v5024_v4 = vld [vmem:[#allocation10 + $0xe4] ss:$8 sps:$4 sm:$0xff]   ;;  %v5022_v5 = vld [vmem:[#allocation10 + $0xe0] ss:$8 sps:$4 sm:$0xff]  }
 0x237   :  { %3138 = vmatprep.subr.bf16.mxu0 %v4946_v7  ;;  %3302 = vmatprep.subr.bf16.mxu1 %v4949_v6  ;;  %v5027_v7 = vld [vmem:[#allocation10 + $0xf4] ss:$8 sps:$4 sm:$0xff]   ;;  %v5025_v6 = vld [vmem:[#allocation10 + $0xf0] ss:$8 sps:$4 sm:$0xff]  }
 0x23a   :  { %3139 = vmatpush1.bf16.msra.mxu0 %v4944_v8  ;;  %3303 = vmatpush1.bf16.msra.mxu1 %v4947_v9  ;;  %v5030_v8 = vld [vmem:[#allocation10 + $0x104] ss:$8 sps:$4 sm:$0xff]  }
 0x23b   :  { %3140 = vmatprep.subr.bf16.mxu0 %v4952_v10  ;;  %3304 = vmatprep.subr.bf16.mxu1 %v4955_v11  ;;  %v5076_v9 = vld [vmem:[#allocation11 + $0x40] sm:$0xff]   ;;  %v5078_v11 = vld [vmem:[#allocation11 + $0x48] sm:$0xff]  }
 0x23c   :  { %v5077_v10 = vld [vmem:[#allocation11] sm:$0xff]  }
 0x23e   :  { %3141 = vmatpush1.bf16.msra.mxu0 %v4950_v12  ;;  %3305 = vmatpush1.bf16.msra.mxu1 %v4953_v13  ;;  %v5079_v12 = vld [vmem:[#allocation11 + $0x8] sm:$0xff]   ;;  %v5080_v13 = vld [vmem:[#allocation11 + $0x50] sm:$0xff]  }
 0x23f   :  { %3142 = vmatprep.subr.bf16.mxu0 %v4958_v15  ;;  %3306 = vmatprep.subr.bf16.mxu1 %v4961_v16  ;;  %v5081_v15 = vld [vmem:[#allocation11 + $0x10] sm:$0xff]   ;;  %v5082_v16 = vld [vmem:[#allocation11 + $0x58] sm:$0xff]  }
 0x242   :  { %3143 = vmatpush1.bf16.msra.mxu0 %v4956_v18  ;;  %3307 = vmatpush1.bf16.msra.mxu1 %v4959_v19  ;;  %v5083_v18 = vld [vmem:[#allocation11 + $0x18] sm:$0xff]   ;;  %v5084_v19 = vld [vmem:[#allocation11 + $0x60] sm:$0xff]  }
 0x243   :  { %3144 = vmatprep.subr.bf16.mxu0 %v4964_v17  ;;  %3308 = vmatprep.subr.bf16.mxu1 %v4967_v25  ;;  %v5086_v17 = vld [vmem:[#allocation11 + $0x68] sm:$0xff]  }
 0x244   :  { %v5087_v25 = vld [vmem:[#allocation11 + $0x28] sm:$0xff]  }
 0x246   :  { %3145 = vmatpush1.bf16.msra.mxu0 %v4962_v26  ;;  %3309 = vmatpush1.bf16.msra.mxu1 %v4965_v27  ;;  %v5473_v26 = vld [vmem:[%s5512_s4] sm:$0xf] }
 0x247   :  { %3146 = vmatprep.subr.bf16.mxu0 %v4970_v29  ;;  %3310 = vmatprep.subr.bf16.mxu1 %v4973_v35  ;;  %v1698_v27 = vrot.slane %v5473_v26, %v5435_v22  ;;  %v1702_v28 = vrot.slane %v5473_v26, %v5440_v24  ;;  %v1710_v29 = vrot.slane %v5473_v26, %v286_v38 }
 0x24a   :  { %3147 = vmatpush1.bf16.msra.mxu0 %v4968_v31  ;;  %3311 = vmatpush1.bf16.msra.mxu1 %v4971_v32 }
 0x24b   :  { %3148 = vmatprep.subr.bf16.mxu0 %v4976_v34  ;;  %3312 = vmatprep.subr.bf16.mxu1 %v4979_v36 }
 0x24e   :  { %3149 = vmatpush1.bf16.msra.mxu0 %v4974_v39  ;;  %3313 = vmatpush1.bf16.msra.mxu1 %v4977_v40 }
 0x24f   :  { %3727 = vmatprep.subr.bf16.mxu0 %v4982_v23  ;;  %4504 = vmatprep.subr.bf16.mxu1 %v5076_v9  ;;  %v1706_v9 = vrot.slane %v5473_v26, %v282_v37  ;;  %v5091_v37 = vld [vmem:[#allocation11 + $0x38] sm:$0xff]  }
 0x251   :  { %3151 = vmatmul.mubr.bf16.vlgmr.msra.gmra.mrb[12].mxu0 %v1435_v43  ;;  %3315 = vmatmul.mubr.bf16.vlgmr.msra.gmra.mrb[12].mxu1 %v1435_v43 }
 0x252   :  { %3728 = vmatpush1.bf16.msra.mxu0 %v4980_v42  ;;  %4505 = vmatpush3.bf16.msra.mxu1 %v5077_v10  ;;  %v5072_v10 = vld [vmem:[#allocation10 + $0x1e4] ss:$8 sps:$4 sm:$0xff]  }
 0x253   :  { %3729 = vmatprep.subr.bf16.mxu0 %v4985_v44  ;;  %4506 = vmatprep.subr.bf16.mxu1 %v5078_v11  ;;  %v5070_v11 = vld [vmem:[#allocation10 + $0x1e0] ss:$8 sps:$4 sm:$0xff]  }
 0x256   :  { %3730 = vmatpush1.bf16.msra.mxu0 %v4983_v30  ;;  %4507 = vmatpush3.bf16.msra.mxu1 %v5079_v12 }
 0x257   :  { %3731 = vmatprep.subr.bf16.mxu0 %v4988_v45  ;;  %4508 = vmatprep.subr.bf16.mxu1 %v5080_v13  ;;  %v5075_v13 = vld [vmem:[#allocation10 + $0x1f4] ss:$8 sps:$4 sm:$0xff]  }
 0x25a   :  { %3732 = vmatpush1.bf16.msra.mxu0 %v4986_v14  ;;  %4509 = vmatpush3.bf16.msra.mxu1 %v5081_v15  ;;  %v5028_v14 = vld [vmem:[#allocation10 + $0x100] ss:$8 sps:$4 sm:$0xff]   ;;  %v5073_v15 = vld [vmem:[#allocation10 + $0x1f0] ss:$8 sps:$4 sm:$0xff]  }
 0x25b   :  { %3733 = vmatprep.subr.bf16.mxu0 %v4991_v46  ;;  %4510 = vmatprep.subr.bf16.mxu1 %v5082_v16 }
 0x25e   :  { %3734 = vmatpush1.bf16.msra.mxu0 %v4989_v0  ;;  %4511 = vmatpush3.bf16.msra.mxu1 %v5083_v18  ;;  %v5033_v0 = vld [vmem:[#allocation10 + $0x114] ss:$8 sps:$4 sm:$0xff]  }
 0x25f   :  { %3735 = vmatprep.subr.bf16.mxu0 %v4994_v48  ;;  %4512 = vmatprep.subr.bf16.mxu1 %v5084_v19  ;;  %v5031_v48 = vld [vmem:[#allocation10 + $0x110] ss:$8 sps:$4 sm:$0xff]  }
 0x260   :  { %v5088_v19 = vld [vmem:[#allocation11 + $0x70] sm:$0xff]  }
 0x262   :  { %3736 = vmatpush1.bf16.msra.mxu0 %v4992_v49  ;;  %4513 = vmatpush3.bf16.msra.mxu1 %v5085_v20  ;;  %v5036_v49 = vld [vmem:[#allocation10 + $0x124] ss:$8 sps:$4 sm:$0xff]   ;;  %v5089_v20 = vld [vmem:[#allocation11 + $0x30] sm:$0xff]  }
 0x263   :  { %3737 = vmatprep.subr.bf16.mxu0 %v4997_v50  ;;  %4514 = vmatprep.subr.bf16.mxu1 %v5086_v17  ;;  %v5034_v50 = vld [vmem:[#allocation10 + $0x120] ss:$8 sps:$4 sm:$0xff]  }
 0x264   :  { %v3395_v17 = vld [vmem:[%s5514_s6] sm:$0x3]  ;;  %s5271_s6 = smov [#allocation13]  }
 0x265   :  { %v3404_v26 = vrot.slane %v3395_v17, %v5440_v24  ;;  %s3995_s22 = sshll.u32 %s5271_s6, 4  ;;  %s3996_s22 = int_to_ptr.vmem [resolvable:$true] %s3995_s22 }
 0x266   :  { %3738 = vmatpush1.bf16.msra.mxu0 %v4995_v51  ;;  %4515 = vmatpush3.bf16.msra.mxu1 %v5087_v25  ;;  %v5039_v51 = vld [vmem:[#allocation10 + $0x134] ss:$8 sps:$4 sm:$0xff]   ;;  %v3400_v25 = vrot.slane %v3395_v17, %v5435_v22  ;;  %s5224_s23 = scalar_lea.vmem %s3996_s22, 128  ;;  %p5229_p7 = scmp.lt.s32.totalorder %s3996_s22, %s3996_s22 }
 0x267   :  { %3739 = vmatprep.subr.bf16.mxu0 %v5000_v52  ;;  %v5037_v52 = vld [vmem:[#allocation10 + $0x130] ss:$8 sps:$4 sm:$0xff]   ;;  %4516 = vmatprep.subr.bf16.mxu1 %v5088_v19  ;;  %p5225_p6 = scmp.ne.s32.totalorder %s3996_s22, %s5224_s23  ;;  %p5230_p8 = scmp.lt.s32.totalorder %s5224_s23, %s5224_s23 }
 0x269   :  { %p5231_p9 = por %p5230_p8, %p5229_p7 }
 0x26a   :  { %3740 = vmatpush1.bf16.msra.mxu0 %v4998_v53  ;;  %v5042_v53 = vld [vmem:[#allocation10 + $0x144] ss:$8 sps:$4 sm:$0xff]   ;;  %4517 = vmatpush3.bf16.msra.mxu1 %v5089_v20 }
 0x26b   :  { %3741 = vmatprep.subr.bf16.mxu0 %v5003_v47  ;;  %v5040_v47 = vld [vmem:[#allocation10 + $0x140] ss:$8 sps:$4 sm:$0xff]   ;;  %4518 = vmatprep.subr.bf16.mxu1 %v5090_v21  ;;  %p5232_p10 = pnand %p5231_p9, %p5225_p6 }
 0x26e   :  { %3742 = vmatpush1.bf16.msra.mxu0 %v5001_v54  ;;  %v5045_v54 = vld [vmem:[#allocation10 + $0x154] ss:$8 sps:$4 sm:$0xff]   ;;  %4519 = vmatpush3.bf16.msra.mxu1 %v5091_v37 }
 0x26f   :  { %3743 = vmatprep.subr.bf16.mxu0 %v5006_v55  ;;  %v5043_v55 = vld [vmem:[#allocation10 + $0x150] ss:$8 sps:$4 sm:$0xff]  }
 0x272   :  { %3744 = vmatpush1.bf16.msra.mxu0 %v5004_v56  ;;  %v5048_v56 = vld [vmem:[#allocation10 + $0x164] ss:$8 sps:$4 sm:$0xff]  }
 0x273   :  { %3745 = vmatprep.subr.bf16.mxu0 %v5009_v57  ;;  %v5046_v57 = vld [vmem:[#allocation10 + $0x160] ss:$8 sps:$4 sm:$0xff]  }
 0x276   :  { %3746 = vmatpush1.bf16.msra.mxu0 %v5007_v58  ;;  %v5051_v58 = vld [vmem:[#allocation10 + $0x174] ss:$8 sps:$4 sm:$0xff]  }
 0x277   :  { %3747 = vmatprep.subr.bf16.mxu0 %v5012_v59  ;;  %v5049_v59 = vld [vmem:[#allocation10 + $0x170] ss:$8 sps:$4 sm:$0xff]  }
 0x27a   :  { %3748 = vmatpush1.bf16.msra.mxu0 %v5010_v60  ;;  %v5054_v60 = vld [vmem:[#allocation10 + $0x184] ss:$8 sps:$4 sm:$0xff]  }
 0x27b   :  { %3749 = vmatprep.subr.bf16.mxu0 %v5015_v61  ;;  %v5052_v61 = vld [vmem:[#allocation10 + $0x180] ss:$8 sps:$4 sm:$0xff]  }
 0x27e   :  { %3750 = vmatpush1.bf16.msra.mxu0 %v5013_v62  ;;  %v5057_v62 = vld [vmem:[#allocation10 + $0x194] ss:$8 sps:$4 sm:$0xff]  }
 0x27f   :  { %3751 = vmatprep.subr.bf16.mxu0 %v5018_v63  ;;  %v5055_v63 = vld [vmem:[#allocation10 + $0x190] ss:$8 sps:$4 sm:$0xff]  }
 0x282   :  { %3752 = vmatpush1.bf16.msra.mxu0 %v5016_v1  ;;  %v5060_v1 = vld [vmem:[#allocation10 + $0x1a4] ss:$8 sps:$4 sm:$0xff]  }
 0x283   :  { %3753 = vmatprep.subr.bf16.mxu0 %v5021_v2  ;;  %v5058_v2 = vld [vmem:[#allocation10 + $0x1a0] ss:$8 sps:$4 sm:$0xff]  }
 0x286   :  { %3754 = vmatpush1.bf16.msra.mxu0 %v5019_v3  ;;  %v5063_v3 = vld [vmem:[#allocation10 + $0x1b4] ss:$8 sps:$4 sm:$0xff]  }
 0x287   :  { %3755 = vmatprep.subr.bf16.mxu0 %v5024_v4  ;;  %v5061_v4 = vld [vmem:[#allocation10 + $0x1b0] ss:$8 sps:$4 sm:$0xff]  }
 0x28a   :  { %3756 = vmatpush1.bf16.msra.mxu0 %v5022_v5  ;;  %v5066_v5 = vld [vmem:[#allocation10 + $0x1c4] ss:$8 sps:$4 sm:$0xff]  }
 0x28b   :  { %3757 = vmatprep.subr.bf16.mxu0 %v5027_v7  ;;  %v5064_v7 = vld [vmem:[#allocation10 + $0x1c0] ss:$8 sps:$4 sm:$0xff]  }
 0x28e   :  { %3758 = vmatpush1.bf16.msra.mxu0 %v5025_v6  ;;  %v5069_v6 = vld [vmem:[#allocation10 + $0x1d4] ss:$8 sps:$4 sm:$0xff]  }
 0x28f   :  { %3768 = vmatprep.subr.bf16.mxu0 %v5030_v8  ;;  %v5067_v8 = vld [vmem:[#allocation10 + $0x1d0] ss:$8 sps:$4 sm:$0xff]  }
 0x324   :  { %v3152_v35 = vpop.f32.mrb[12].mxu0  ;;  %v5482_v31 = vpop.f32.mrb[12].mxu1 }
 0x325   :  { %v4538_v32 = vadd.f32 %v3152_v35, %v1698_v27  ;;  %v3154_v33 = vpop.f32.mrb[13].mxu0  ;;  %v3318_v34 = vpop.f32.mrb[13].mxu1  ;;  %v4540_v12 = vadd.f32 %v5482_v31, %v1706_v9 }
 0x326   :  { %v4539_v36 = vadd.f32 %v3154_v33, %v1702_v28  ;;  %v4541_v39 = vadd.f32 %v3318_v34, %v1710_v29  ;;  %v3156_v40 = vpop.f32.mrb[14].mxu0  ;;  %v3320_v41 = vpop.f32.mrb[14].mxu1 }
 0x327   :  { %v3323_v23 = vmax.f32 %v4538_v32, 0.0  ;;  %v3157_v42 = vpop.f32.mrb[15].mxu0  ;;  %v3321_v43 = vpop.f32.mrb[15].mxu1  ;;  %v3325_v16 = vmax.f32 %v4540_v12, 0.0  ;;  %v4487_v41 = vld [vmem:[%s5516_s8] ss:$0 sm:$0xff] }
 0x328   :  { %v3324_v44 = vmax.f32 %v4539_v36, 0.0  ;;  %v3326_v30 = vmax.f32 %v4541_v39, 0.0 }
 0x329   :  { %v3327_v46 = vpack.c.bf16 %v3323_v23, %v3323_v23  ;;  %v3329_v18 = vpack.c.bf16 %v3325_v16, %v3325_v16 }
 0x32a   :  { %v3328_v45 = vpack.c.bf16 %v3324_v44, %v3324_v44  ;;  %v3330_v38 = vpack.c.bf16 %v3326_v30, %v3326_v30 }
 0x32c   :  { %3759 = vmatprep.mubr.bf16.mxu0 %v3328_v45 }
 0x32d   :  { %3760 = vmatmul.mubr.bf16.vlgmr.msra.gmra.mrb[16].mxu0 %v3327_v46 }
 0x32e   :  { %3769 = vmatpush1.bf16.msra.mxu0 %v5028_v14  ;;  %3800 = vmatprep.mubr.bf16.mxu0 %v3330_v38 }
 0x32f   :  { %3770 = vmatprep.subr.bf16.mxu0 %v5033_v0 }
 0x332   :  { %3771 = vmatpush1.bf16.msra.mxu0 %v5031_v48 }
 0x333   :  { %3772 = vmatprep.subr.bf16.mxu0 %v5036_v49 }
 0x336   :  { %3773 = vmatpush1.bf16.msra.mxu0 %v5034_v50 }
 0x337   :  { %3774 = vmatprep.subr.bf16.mxu0 %v5039_v51 }
 0x33a   :  { %3775 = vmatpush1.bf16.msra.mxu0 %v5037_v52 }
 0x33b   :  { %3776 = vmatprep.subr.bf16.mxu0 %v5042_v53 }
 0x33e   :  { %3777 = vmatpush1.bf16.msra.mxu0 %v5040_v47 }
 0x33f   :  { %3778 = vmatprep.subr.bf16.mxu0 %v5045_v54 }
 0x342   :  { %3779 = vmatpush1.bf16.msra.mxu0 %v5043_v55 }
 0x343   :  { %3780 = vmatprep.subr.bf16.mxu0 %v5048_v56 }
 0x346   :  { %3781 = vmatpush1.bf16.msra.mxu0 %v5046_v57 }
 0x347   :  { %3782 = vmatprep.subr.bf16.mxu0 %v5051_v58 }
 0x34a   :  { %3783 = vmatpush1.bf16.msra.mxu0 %v5049_v59 }
 0x34b   :  { %3784 = vmatprep.subr.bf16.mxu0 %v5054_v60 }
 0x34e   :  { %3785 = vmatpush1.bf16.msra.mxu0 %v5052_v61 }
 0x34f   :  { %3786 = vmatprep.subr.bf16.mxu0 %v5057_v62 }
 0x352   :  { %3787 = vmatpush1.bf16.msra.mxu0 %v5055_v63 }
 0x353   :  { %3788 = vmatprep.subr.bf16.mxu0 %v5060_v1 }
 0x356   :  { %3789 = vmatpush1.bf16.msra.mxu0 %v5058_v2 }
 0x357   :  { %3790 = vmatprep.subr.bf16.mxu0 %v5063_v3 }
 0x35a   :  { %3791 = vmatpush1.bf16.msra.mxu0 %v5061_v4 }
 0x35b   :  { %3792 = vmatprep.subr.bf16.mxu0 %v5066_v5 }
 0x35e   :  { %3793 = vmatpush1.bf16.msra.mxu0 %v5064_v7 }
 0x35f   :  { %3794 = vmatprep.subr.bf16.mxu0 %v5069_v6 }
 0x362   :  { %3795 = vmatpush1.bf16.msra.mxu0 %v5067_v8 }
 0x363   :  { %3796 = vmatprep.subr.bf16.mxu0 %v5072_v10 }
 0x366   :  { %3797 = vmatpush1.bf16.msra.mxu0 %v5070_v11 }
 0x367   :  { %3798 = vmatprep.subr.bf16.mxu0 %v5075_v13 }
 0x36a   :  { %3799 = vmatpush1.bf16.msra.mxu0 %v5073_v15 }
 0x36d   :  { %3801 = vmatmul.mubr.bf16.vlgmr.msra.gmra.mrb[16].mxu0 %v3329_v18 }
 0x440   :  { %v3802_v27 = vpop.f32.mrb[16].mxu0 }
 0x441   :  { %v4542_v28 = vadd.f32 %v3802_v27, %v3400_v25  ;;  %v3804_v29 = vpop.f32.mrb[17].mxu0 }
 0x442   :  { %v4543_v35 = vadd.f32 %v3804_v29, %v3404_v26  ;;  %v3806_v31 = vpop.f32.mrb[18].mxu0 }
 0x443   :  { %v3809_v32 = vmax.f32 %v4542_v28, 0.0  ;;  %v3807_v33 = vpop.f32.mrb[19].mxu0 }
 0x444   :  { %v3810_v34 = vmax.f32 %v4543_v35, 0.0 }
 0x445   :  { %v3811_v39 = vpack.c.bf16 %v3809_v32, %v3809_v32 }
 0x446   :  { %v3812_v36 = vpack.c.bf16 %v3810_v34, %v3810_v34 }
 0x448   :  { %3980 = vmatprep.mubr.bf16.mxu1 %v3812_v36 }
 0x449   :  { %3981 = vmatmul.mubr.bf16.vlgmr.msra.gmra.mrb[16].mxu1 %v3811_v39 }
 0x51c   :  { %v4520_v40 = vpop.f32.mrb[16].mxu1 }
 0x51d   :  { %v4521_v22 = vpop.f32.mrb[17].mxu1 }
 0x51e   :  { %v4522_v24 = vadd.f32 %v4521_v22, %v4520_v40  ;;  %v4523_v23 = vpop.f32.mrb[18].mxu1 }
 0x51f   :  { %v4524_v42 = vpop.f32.mrb[19].mxu1 }
 0x520   :  { %v3983_v43 = vadd.f32 %v4522_v24, %v4487_v41 }
 0x522   :  { %3988 = vst [vmem:[#allocation13] sm:$0xff] %v3983_v43 }
 0x523   :  { %5235 = shalt.err (!%p5232_p10)
}
 0x524   :  { %s5236_s8 = scalar_lea.hbm %s5517_s9, 128 }
 0x525   :  { %p5237_p11 = scmp.ne.s32.totalorder %s5517_s9, %s5236_s8  ;;  %p5240_p12 = scmp.lt.u32.totalorder %s5236_s8, %s5517_s9 }
 0x527   :  { %p5242_p13 = pnand %p5240_p12, %p5237_p11 }
 0x529   :  { %5245 = shalt.err (!%p5242_p13)
}
 0x52a   :  { %3998 = dma.vmem_to_hbm [thread:$0]  %s3996_s22, 128, %s5517_s9, [#allocation4]  }
 0x52b   :  { %5254 = dma.done.wait [#allocation4], 128  }
 0x52c   :  { %5255 = vsyncadd [#allocation4], 4294967168 }
 0x52d   :  { %4002 = vsyncpa [#allocation3], 1 }
 0x52e   :  { %4003 = vsyncpa [#allocation6], 1 }
 0x52f   :  { %4004 = vsyncpa [#allocation9], 1 }
 0x530   :  { %4005 = vsyncpa [#allocation12], 1 }
 0x531   :  { %4006 = vsyncpa [#allocation4], 1 }

</bundles_post_ra>
